<compile_context>
chip_gen: v7x
topology: tpu7x:2x2x1
jax: 0.10.0
libtpu: 0.0.40
codegen_flags: <defaults>
</compile_context>

<pallas_src>
import math

import jax
import jax.numpy as jnp
import numpy as np
from jax.experimental import pallas as pl
from jax.experimental.pallas import tpu as pltpu


def _round_up(x, m):
    return ((x + m - 1) // m) * m


def _vmem_capacity_bytes():
    """Physical per-core VMEM; conservative 64 MiB fallback (legal everywhere)."""
    try:
        info = pltpu.get_tpu_info()
        cap = getattr(info, "vmem_capacity_bytes", None)
        if cap:
            return int(cap)
    except Exception:
        pass
    return 64 << 20


def _lgcl_prop_kernel(adj_ref, u_mul_s_ref, v_mul_s_ref, ut_ref, vt_ref,
                      eu0_ref, ei0_ref,
                      eu_sum_ref, ei_sum_ref, gu_sum_ref, gi_sum_ref,
                      cur_eu, cur_ei):
    layer = pl.program_id(0)

    @pl.when(layer == 0)
    def _init():
        cur_eu[...] = eu0_ref[...]
        cur_ei[...] = ei0_ref[...]
        # E_u = E_u^(0) + sum_l Z_u^(l)   ;   G_u = sum_l G_u^(l)
        eu_sum_ref[...] = eu0_ref[...]
        ei_sum_ref[...] = ei0_ref[...]
        gu_sum_ref[...] = jnp.zeros_like(gu_sum_ref)
        gi_sum_ref[...] = jnp.zeros_like(gi_sum_ref)

    e_u = cur_eu[...]                      # f32 [U, d]
    e_i = cur_ei[...]                      # f32 [I, d]
    adj = adj_ref[...]
    mxu_dtype = adj.dtype                  # bf16 (fast path) or f32 (exact)

    # Exactly one VPU pack per operand per layer (values change every layer,
    # so this is the minimum).  The e_u transpose is done in f32 ([U,d]->[d,U],
    # d=128 lanes) before packing; the O(U*I) adjacency is never transposed.
    e_i_mx = e_i.astype(mxu_dtype)                     # [I, d]
    e_ut_mx = e_u.T.astype(mxu_dtype)                  # [d, U]

    # Z_u = adj @ E_i
    z_u = jnp.dot(adj, e_i_mx, preferred_element_type=jnp.float32)
    # Z_i = adj.T @ E_u == (E_u.T @ adj).T : only small [d,U]/[d,I] tensors
    # ever hit the XLU transpose path.
    z_i = jnp.dot(e_ut_mx, adj, preferred_element_type=jnp.float32).T

    # Low-rank SVD propagation (rank-q factors, kept in f32):
    # G_u = (U S) @ (V.T @ E_i) ;  G_i = (V S) @ (U.T @ E_u)
    vt_ei = jnp.dot(vt_ref[...], e_i, preferred_element_type=jnp.float32)
    g_u = jnp.dot(u_mul_s_ref[...], vt_ei, preferred_element_type=jnp.float32)
    ut_eu = jnp.dot(ut_ref[...], e_u, preferred_element_type=jnp.float32)
    g_i = jnp.dot(v_mul_s_ref[...], ut_eu, preferred_element_type=jnp.float32)

    # running sums over layers (outputs are VMEM-resident accumulators)
    eu_sum_ref[...] += z_u
    ei_sum_ref[...] += z_i
    gu_sum_ref[...] += g_u
    gi_sum_ref[...] += g_i

    # carry E^(l) -> E^(l+1)  (kept in f32; bf16 rounding only enters through
    # the adj matmul operands, not the stored carry)
    cur_eu[...] = z_u
    cur_ei[...] = z_i


def lgcl_propagate(adj, u_mul_s, v_mul_s, ut, vt, e_u0, e_i0, n_layers):
    """Runs the n_layers propagation loop inside a single pallas_call.

    All inputs are assumed already lane/sublane padded (multiples of 128) by
    the caller; adj carries the MXU dtype (bf16 or f32).
    """
    U, I = adj.shape
    d = e_u0.shape[1]
    q = ut.shape[0]

    def full(shape):
        # Whole-array block, constant across the layer axis; single-buffered
        # because there is nothing to prefetch (index_map never changes).
        return pl.BlockSpec(shape, lambda l: (0, 0),
                            pipeline_mode=pl.Buffered(1))

    in_specs = [full(adj.shape), full(u_mul_s.shape), full(v_mul_s.shape),
                full(ut.shape), full(vt.shape),
                full(e_u0.shape), full(e_i0.shape)]
    out_specs = [pl.BlockSpec((U, d), lambda l: (0, 0)),
                 pl.BlockSpec((I, d), lambda l: (0, 0)),
                 pl.BlockSpec((U, d), lambda l: (0, 0)),
                 pl.BlockSpec((I, d), lambda l: (0, 0))]

    grid_spec = pltpu.PrefetchScalarGridSpec(
        num_scalar_prefetch=0,
        grid=(n_layers,),
        in_specs=in_specs,
        out_specs=out_specs,
        scratch_shapes=[pltpu.VMEM((U, d), jnp.float32),
                        pltpu.VMEM((I, d), jnp.float32)],
    )

    out_shapes = (jax.ShapeDtypeStruct((U, d), jnp.float32),
                  jax.ShapeDtypeStruct((I, d), jnp.float32),
                  jax.ShapeDtypeStruct((U, d), jnp.float32),
                  jax.ShapeDtypeStruct((I, d), jnp.float32))

    # VMEM budget from the actual resident buffers (inputs single-buffered,
    # outputs possibly double-buffered, + the two f32 carry scratches), then
    # capped generation-aware: physical capacity minus ~12 MiB headroom
    # (~52 MiB on v7x, up to ~116 MiB on v5e/v6e 128 MiB parts).
    itemsize = jnp.dtype(adj.dtype).itemsize
    f32 = 4
    in_bytes = (U * I * itemsize
                + f32 * (u_mul_s.size + v_mul_s.size + ut.size + vt.size
                         + e_u0.size + e_i0.size))
    out_bytes = f32 * 2 * (U + I) * d          # four f32 accumulators
    scratch_bytes = f32 * (U + I) * d
    needed = in_bytes + 2 * out_bytes + scratch_bytes
    cap_hi = max(_vmem_capacity_bytes() - (12 << 20), 16 << 20)
    vmem_limit = int(min(max(2 * needed + (4 << 20), 32 << 20), cap_hi))

    flops_per_layer = (4 * U * I * d                    # two adj matmuls
                       + 2 * q * I * d + 2 * U * q * d  # G_u
                       + 2 * q * U * d + 2 * I * q * d)  # G_i
    cost = pl.CostEstimate(flops=int(n_layers * flops_per_layer),
                           transcendentals=0,
                           bytes_accessed=int(in_bytes + out_bytes))

    return pl.pallas_call(
        _lgcl_prop_kernel,
        out_shape=out_shapes,
        grid_spec=grid_spec,
        compiler_params=pltpu.CompilerParams(
            dimension_semantics=("arbitrary",),
            vmem_limit_bytes=vmem_limit),
        cost_estimate=cost,
    )(adj, u_mul_s, v_mul_s, ut, vt, e_u0, e_i0)


def lgcl_precompute(norm_adj, q, emb_size, adj_dtype=jnp.bfloat16):
    """Per-graph work (SVD factors + padding/cast of the adjacency).

    Cache the result across forward() calls: for real LightGCL sizes the dense
    SVD and the full-adj pad/copy dominate wall time, not the kernel.
    """
    U, I = norm_adj.shape
    U_pad = _round_up(U, 128)
    I_pad = _round_up(I, 128)
    D_pad = _round_up(emb_size, 128)
    Q_pad = _round_up(q, 128)

    # TODO(synk): torch.svd_lowrank uses a randomized range finder; here we use
    # the exact SVD truncated to rank q (same propagation math, deterministic).
    svd_u_f, svd_s_f, svd_vt_f = jnp.linalg.svd(norm_adj, full_matrices=False)
    svd_u = svd_u_f[:, :q]               # [U, q]
    svd_s = svd_s_f[:q]                  # [q]
    svd_v = svd_vt_f[:q, :].T            # [I, q]

    u_mul_s = svd_u * svd_s[None, :]     # svd_u @ diag(svd_s)
    v_mul_s = svd_v * svd_s[None, :]     # svd_v @ diag(svd_s)
    ut = svd_u.T
    vt = svd_v.T

    # Zero padding is exact: padded rows/cols contribute 0 to every product.
    adj_p = jnp.pad(norm_adj, ((0, U_pad - U), (0, I_pad - I))).astype(adj_dtype)
    u_mul_s_p = jnp.pad(u_mul_s, ((0, U_pad - U), (0, Q_pad - q)))
    v_mul_s_p = jnp.pad(v_mul_s, ((0, I_pad - I), (0, Q_pad - q)))
    ut_p = jnp.pad(ut, ((0, Q_pad - q), (0, U_pad - U)))
    vt_p = jnp.pad(vt, ((0, Q_pad - q), (0, I_pad - I)))

    return {"adj": adj_p, "u_mul_s": u_mul_s_p, "v_mul_s": v_mul_s_p,
            "ut": ut_p, "vt": vt_p,
            "dims": (U, I, emb_size, U_pad, I_pad, D_pad)}


def lgcl_forward(norm_adj, user_emb, item_emb, users, items, n_layers, q,
                 adj_dtype=jnp.bfloat16, precomputed=None):
    """Equivalent of LGCLEncoder.forward(users, items)."""
    U, I = norm_adj.shape
    d = user_emb.shape[1]

    if n_layers == 0:
        # Empty grid would leave the accumulators uninitialized; match the
        # reference (E sums are just the initial embeddings, G sums are 0).
        g_u = jnp.zeros_like(user_emb)
        g_i = jnp.zeros_like(item_emb)
        return (user_emb[users, :], item_emb[items, :],
                g_u[users, :], g_i[items, :])

    if precomputed is None:
        precomputed = lgcl_precompute(norm_adj, q, d, adj_dtype=adj_dtype)
    _, _, _, U_pad, I_pad, D_pad = precomputed["dims"]

    # Only the (trainable) embeddings are padded per forward (layout plumbing).
    eu0_p = jnp.pad(user_emb, ((0, U_pad - U), (0, D_pad - d)))
    ei0_p = jnp.pad(item_emb, ((0, I_pad - I), (0, D_pad - d)))

    e_u_sum, e_i_sum, g_u_sum, g_i_sum = lgcl_propagate(
        precomputed["adj"], precomputed["u_mul_s"], precomputed["v_mul_s"],
        precomputed["ut"], precomputed["vt"], eu0_p, ei0_p, n_layers)

    # final row-gather + un-pad (glue)
    return (e_u_sum[users, :d], e_i_sum[items, :d],
            g_u_sum[users, :d], g_i_sum[items, :d])


# ------------------------- reference (pure JAX) ------------------------------
def _reference_propagate(adj, u_mul_s, v_mul_s, ut, vt, e_u0, e_i0, n_layers):
    E_u_list, E_i_list, G_u_list, G_i_list = [e_u0], [e_i0], [], []
    for layer in range(1, n_layers + 1):
        Z_u = adj @ E_i_list[layer - 1]
        Z_i = adj.T @ E_u_list[layer - 1]
        G_u = u_mul_s @ (vt @ E_i_list[layer - 1])
        G_i = v_mul_s @ (ut @ E_u_list[layer - 1])
        E_u_list.append(Z_u)
        E_i_list.append(Z_i)
        G_u_list.append(G_u)
        G_i_list.append(G_i)
    return (sum(E_u_list), sum(E_i_list), sum(G_u_list), sum(G_i_list))


def _xavier_uniform(key, shape):
    fan_in, fan_out = shape[0], shape[1]
    bound = math.sqrt(6.0 / (fan_in + fan_out))
    return jax.random.uniform(key, shape, jnp.float32, -bound, bound)


if __name__ == "__main__":
    user_count, item_count = 64, 80
    emb_size, q, n_layers = 32, 8, 2
    n_batch = 8

    key = jax.random.PRNGKey(0)
    k_adj, k_u, k_i, k_users, k_items = jax.random.split(key, 5)

    # deterministic synthetic normalized bipartite adjacency (dense stand-in
    # for the scipy sparse norm_adj)
    mask = (jax.random.uniform(k_adj, (user_count, item_count)) < 0.1
            ).astype(jnp.float32)
    deg_u = jnp.maximum(mask.sum(axis=1, keepdims=True), 1.0)
    deg_i = jnp.maximum(mask.sum(axis=0, keepdims=True), 1.0)
    norm_adj = mask / jnp.sqrt(deg_u) / jnp.sqrt(deg_i)

    user_emb = _xavier_uniform(k_u, (user_count, emb_size))
    item_emb = _xavier_uniform(k_i, (item_count, emb_size))
    users = jax.random.randint(k_users, (n_batch,), 0, user_count)
    items = jax.random.randint(k_items, (n_batch,), 0, item_count)

    # pure-JAX reference of the same math
    svd_u_f, svd_s_f, svd_vt_f = jnp.linalg.svd(norm_adj, full_matrices=False)
    su, ss, sv = svd_u_f[:, :q], svd_s_f[:q], svd_vt_f[:q, :].T
    ref_eu, ref_ei, ref_gu, ref_gi = _reference_propagate(
        norm_adj, su * ss[None, :], sv * ss[None, :], su.T, sv.T,
        user_emb, item_emb, n_layers)
    refs = (ref_eu[users, :], ref_ei[items, :], ref_gu[users, :],
            ref_gi[items, :])

    # 1) exact path (f32 adjacency on the MXU) — tight tolerance
    outs = lgcl_forward(norm_adj, user_emb, item_emb, users, items,
                        n_layers, q, adj_dtype=jnp.float32)
    outs = jax.block_until_ready(outs)
    for got, want in zip(outs, refs):
        np.testing.assert_allclose(np.asarray(got), np.asarray(want),
                                   rtol=2e-4, atol=2e-5)

    # 2) default fast path (bf16 adjacency / bf16 operand packs, f32
    #    accumulation and f32 carries) — looser tolerance (bf16 rounding of
    #    the adj matmul operands compounds across layers).
    outs_bf16 = lgcl_forward(norm_adj, user_emb, item_emb, users, items,
                             n_layers, q)
    outs_bf16 = jax.block_until_ready(outs_bf16)
    for got, want in zip(outs_bf16, refs):
        np.testing.assert_allclose(np.asarray(got), np.asarray(want),
                                   rtol=5e-2, atol=1e-2)

    print("KERNEL_OK")
</pallas_src>

<mosaic_0001>
module attributes {stable_mosaic.version = 11 : i64} {
  func.func @_lgcl_prop_kernel(%arg0: i32, %arg1: memref<128x128xf32, #tpu.memory_space<vmem>>, %arg2: memref<128x128xf32, #tpu.memory_space<vmem>>, %arg3: memref<128x128xf32, #tpu.memory_space<vmem>>, %arg4: memref<128x128xf32, #tpu.memory_space<vmem>>, %arg5: memref<128x128xf32, #tpu.memory_space<vmem>>, %arg6: memref<128x128xf32, #tpu.memory_space<vmem>>, %arg7: memref<128x128xf32, #tpu.memory_space<vmem>>, %arg8: memref<128x128xf32, #tpu.memory_space<vmem>>, %arg9: memref<128x128xf32, #tpu.memory_space<vmem>>, %arg10: memref<128x128xf32, #tpu.memory_space<vmem>>, %arg11: memref<128x128xf32, #tpu.memory_space<vmem>>, %arg12: memref<128x128xf32, #tpu.memory_space<vmem>>, %arg13: memref<128x128xf32, #tpu.memory_space<vmem>>) attributes {dimension_semantics = [#tpu.dimension_semantics<arbitrary>], iteration_bounds = array<i64: 2>, scalar_prefetch = 0 : i64, scratch_operands = 2 : i64, tpu.core_type = #tpu.core_type<tc>, window_params = [{pipeline_mode = #tpu.pipeline_mode<synchronous>, transform_indices = @transform_0, window_bounds = array<i64: 128, 128>}, {pipeline_mode = #tpu.pipeline_mode<synchronous>, transform_indices = @transform_1, window_bounds = array<i64: 128, 128>}, {pipeline_mode = #tpu.pipeline_mode<synchronous>, transform_indices = @transform_2, window_bounds = array<i64: 128, 128>}, {pipeline_mode = #tpu.pipeline_mode<synchronous>, transform_indices = @transform_3, window_bounds = array<i64: 128, 128>}, {pipeline_mode = #tpu.pipeline_mode<synchronous>, transform_indices = @transform_4, window_bounds = array<i64: 128, 128>}, {pipeline_mode = #tpu.pipeline_mode<synchronous>, transform_indices = @transform_5, window_bounds = array<i64: 128, 128>}, {pipeline_mode = #tpu.pipeline_mode<synchronous>, transform_indices = @transform_6, window_bounds = array<i64: 128, 128>}, {pipeline_mode = #tpu.pipeline_mode<synchronous>, transform_indices = @transform_7, window_bounds = array<i64: 128, 128>}, {pipeline_mode = #tpu.pipeline_mode<synchronous>, transform_indices = @transform_8, window_bounds = array<i64: 128, 128>}, {pipeline_mode = #tpu.pipeline_mode<synchronous>, transform_indices = @transform_9, window_bounds = array<i64: 128, 128>}, {pipeline_mode = #tpu.pipeline_mode<synchronous>, transform_indices = @transform_10, window_bounds = array<i64: 128, 128>}]} {
    %c0_i32 = arith.constant 0 : i32
    %0 = arith.cmpi eq, %arg0, %c0_i32 : i32
    %1 = arith.extui %0 : i1 to i32
    %c0_i32_0 = arith.constant 0 : i32
    %2 = arith.cmpi ne, %1, %c0_i32_0 : i32
    scf.if %2 {
      %c0_39 = arith.constant 0 : index
      %c0_40 = arith.constant 0 : index
      %32 = vector.load %arg6[%c0_39, %c0_40] : memref<128x128xf32, #tpu.memory_space<vmem>>, vector<128x128xf32>
      %c0_41 = arith.constant 0 : index
      %c0_42 = arith.constant 0 : index
      %33 = vector.load %arg12[%c0_41, %c0_42] : memref<128x128xf32, #tpu.memory_space<vmem>>, vector<128x128xf32>
      tpu.vector_store %arg12[%c0_41, %c0_42], %32 {strides = array<i32>} : memref<128x128xf32, #tpu.memory_space<vmem>>, vector<128x128xf32>,
      %c0_43 = arith.constant 0 : index
      %c0_44 = arith.constant 0 : index
      %34 = vector.load %arg7[%c0_43, %c0_44] : memref<128x128xf32, #tpu.memory_space<vmem>>, vector<128x128xf32>
      %c0_45 = arith.constant 0 : index
      %c0_46 = arith.constant 0 : index
      %35 = vector.load %arg13[%c0_45, %c0_46] : memref<128x128xf32, #tpu.memory_space<vmem>>, vector<128x128xf32>
      tpu.vector_store %arg13[%c0_45, %c0_46], %34 {strides = array<i32>} : memref<128x128xf32, #tpu.memory_space<vmem>>, vector<128x128xf32>,
      %c0_47 = arith.constant 0 : index
      %c0_48 = arith.constant 0 : index
      %36 = vector.load %arg6[%c0_47, %c0_48] : memref<128x128xf32, #tpu.memory_space<vmem>>, vector<128x128xf32>
      %c0_49 = arith.constant 0 : index
      %c0_50 = arith.constant 0 : index
      %37 = vector.load %arg8[%c0_49, %c0_50] : memref<128x128xf32, #tpu.memory_space<vmem>>, vector<128x128xf32>
      tpu.vector_store %arg8[%c0_49, %c0_50], %36 {strides = array<i32>} : memref<128x128xf32, #tpu.memory_space<vmem>>, vector<128x128xf32>,
      %c0_51 = arith.constant 0 : index
      %c0_52 = arith.constant 0 : index
      %38 = vector.load %arg7[%c0_51, %c0_52] : memref<128x128xf32, #tpu.memory_space<vmem>>, vector<128x128xf32>
      %c0_53 = arith.constant 0 : index
      %c0_54 = arith.constant 0 : index
      %39 = vector.load %arg9[%c0_53, %c0_54] : memref<128x128xf32, #tpu.memory_space<vmem>>, vector<128x128xf32>
      tpu.vector_store %arg9[%c0_53, %c0_54], %38 {strides = array<i32>} : memref<128x128xf32, #tpu.memory_space<vmem>>, vector<128x128xf32>,
      %cst_55 = arith.constant 0.000000e+00 : f32
      %40 = vector.broadcast %cst_55 : f32 to vector<128x128xf32>
      %c0_56 = arith.constant 0 : index
      %c0_57 = arith.constant 0 : index
      %41 = vector.load %arg10[%c0_56, %c0_57] : memref<128x128xf32, #tpu.memory_space<vmem>>, vector<128x128xf32>
      tpu.vector_store %arg10[%c0_56, %c0_57], %40 {strides = array<i32>} : memref<128x128xf32, #tpu.memory_space<vmem>>, vector<128x128xf32>,
      %cst_58 = arith.constant 0.000000e+00 : f32
      %42 = vector.broadcast %cst_58 : f32 to vector<128x128xf32>
      %c0_59 = arith.constant 0 : index
      %c0_60 = arith.constant 0 : index
      %43 = vector.load %arg11[%c0_59, %c0_60] : memref<128x128xf32, #tpu.memory_space<vmem>>, vector<128x128xf32>
      tpu.vector_store %arg11[%c0_59, %c0_60], %42 {strides = array<i32>} : memref<128x128xf32, #tpu.memory_space<vmem>>, vector<128x128xf32>,
    } else {
    }
    %c0 = arith.constant 0 : index
    %c0_1 = arith.constant 0 : index
    %3 = vector.load %arg12[%c0, %c0_1] : memref<128x128xf32, #tpu.memory_space<vmem>>, vector<128x128xf32>
    %c0_2 = arith.constant 0 : index
    %c0_3 = arith.constant 0 : index
    %4 = vector.load %arg13[%c0_2, %c0_3] : memref<128x128xf32, #tpu.memory_space<vmem>>, vector<128x128xf32>
    %c0_4 = arith.constant 0 : index
    %c0_5 = arith.constant 0 : index
    %5 = vector.load %arg1[%c0_4, %c0_5] : memref<128x128xf32, #tpu.memory_space<vmem>>, vector<128x128xf32>
    %6 = tpu.transpose %3, [1, 0] : vector<128x128xf32> -> vector<128x128xf32>
    %cst = arith.constant dense<0.000000e+00> : vector<128x128xf32>
    %7 = tpu.matmul %5, %4, %cst {dimension_numbers = #tpu.dot_dimension_numbers<[1], [0], [0], [1], [0, 0, 1, 1], [], []>} : vector<128x128xf32>, vector<128x128xf32>, vector<128x128xf32> -> vector<128x128xf32>
    %cst_6 = arith.constant dense<0.000000e+00> : vector<128x128xf32>
    %8 = tpu.matmul %6, %5, %cst_6 {dimension_numbers = #tpu.dot_dimension_numbers<[1], [0], [0], [1], [0, 0, 1, 1], [], []>} : vector<128x128xf32>, vector<128x128xf32>, vector<128x128xf32> -> vector<128x128xf32>
    %9 = tpu.transpose %8, [1, 0] : vector<128x128xf32> -> vector<128x128xf32>
    %c0_7 = arith.constant 0 : index
    %c0_8 = arith.constant 0 : index
    %10 = vector.load %arg5[%c0_7, %c0_8] : memref<128x128xf32, #tpu.memory_space<vmem>>, vector<128x128xf32>
    %cst_9 = arith.constant dense<0.000000e+00> : vector<128x128xf32>
    %11 = tpu.matmul %10, %4, %cst_9 {dimension_numbers = #tpu.dot_dimension_numbers<[1], [0], [0], [1], [0, 0, 1, 1], [], []>} : vector<128x128xf32>, vector<128x128xf32>, vector<128x128xf32> -> vector<128x128xf32>
    %c0_10 = arith.constant 0 : index
    %c0_11 = arith.constant 0 : index
    %12 = vector.load %arg2[%c0_10, %c0_11] : memref<128x128xf32, #tpu.memory_space<vmem>>, vector<128x128xf32>
    %cst_12 = arith.constant dense<0.000000e+00> : vector<128x128xf32>
    %13 = tpu.matmul %12, %11, %cst_12 {dimension_numbers = #tpu.dot_dimension_numbers<[1], [0], [0], [1], [0, 0, 1, 1], [], []>} : vector<128x128xf32>, vector<128x128xf32>, vector<128x128xf32> -> vector<128x128xf32>
    %c0_13 = arith.constant 0 : index
    %c0_14 = arith.constant 0 : index
    %14 = vector.load %arg4[%c0_13, %c0_14] : memref<128x128xf32, #tpu.memory_space<vmem>>, vector<128x128xf32>
    %cst_15 = arith.constant dense<0.000000e+00> : vector<128x128xf32>
    %15 = tpu.matmul %14, %3, %cst_15 {dimension_numbers = #tpu.dot_dimension_numbers<[1], [0], [0], [1], [0, 0, 1, 1], [], []>} : vector<128x128xf32>, vector<128x128xf32>, vector<128x128xf32> -> vector<128x128xf32>
    %c0_16 = arith.constant 0 : index
    %c0_17 = arith.constant 0 : index
    %16 = vector.load %arg3[%c0_16, %c0_17] : memref<128x128xf32, #tpu.memory_space<vmem>>, vector<128x128xf32>
    %cst_18 = arith.constant dense<0.000000e+00> : vector<128x128xf32>
    %17 = tpu.matmul %16, %15, %cst_18 {dimension_numbers = #tpu.dot_dimension_numbers<[1], [0], [0], [1], [0, 0, 1, 1], [], []>} : vector<128x128xf32>, vector<128x128xf32>, vector<128x128xf32> -> vector<128x128xf32>
    %c0_19 = arith.constant 0 : index
    %c0_20 = arith.constant 0 : index
    %18 = vector.load %arg8[%c0_19, %c0_20] : memref<128x128xf32, #tpu.memory_space<vmem>>, vector<128x128xf32>
    %19 = arith.addf %18, %7 : vector<128x128xf32>
    %c0_21 = arith.constant 0 : index
    %c0_22 = arith.constant 0 : index
    %20 = vector.load %arg8[%c0_21, %c0_22] : memref<128x128xf32, #tpu.memory_space<vmem>>, vector<128x128xf32>
    tpu.vector_store %arg8[%c0_21, %c0_22], %19 {strides = array<i32>} : memref<128x128xf32, #tpu.memory_space<vmem>>, vector<128x128xf32>,
    %c0_23 = arith.constant 0 : index
    %c0_24 = arith.constant 0 : index
    %21 = vector.load %arg9[%c0_23, %c0_24] : memref<128x128xf32, #tpu.memory_space<vmem>>, vector<128x128xf32>
    %22 = arith.addf %21, %9 : vector<128x128xf32>
    %c0_25 = arith.constant 0 : index
    %c0_26 = arith.constant 0 : index
    %23 = vector.load %arg9[%c0_25, %c0_26] : memref<128x128xf32, #tpu.memory_space<vmem>>, vector<128x128xf32>
    tpu.vector_store %arg9[%c0_25, %c0_26], %22 {strides = array<i32>} : memref<128x128xf32, #tpu.memory_space<vmem>>, vector<128x128xf32>,
    %c0_27 = arith.constant 0 : index
    %c0_28 = arith.constant 0 : index
    %24 = vector.load %arg10[%c0_27, %c0_28] : memref<128x128xf32, #tpu.memory_space<vmem>>, vector<128x128xf32>
    %25 = arith.addf %24, %13 : vector<128x128xf32>
    %c0_29 = arith.constant 0 : index
    %c0_30 = arith.constant 0 : index
    %26 = vector.load %arg10[%c0_29, %c0_30] : memref<128x128xf32, #tpu.memory_space<vmem>>, vector<128x128xf32>
    tpu.vector_store %arg10[%c0_29, %c0_30], %25 {strides = array<i32>} : memref<128x128xf32, #tpu.memory_space<vmem>>, vector<128x128xf32>,
    %c0_31 = arith.constant 0 : index
    %c0_32 = arith.constant 0 : index
    %27 = vector.load %arg11[%c0_31, %c0_32] : memref<128x128xf32, #tpu.memory_space<vmem>>, vector<128x128xf32>
    %28 = arith.addf %27, %17 : vector<128x128xf32>
    %c0_33 = arith.constant 0 : index
    %c0_34 = arith.constant 0 : index
    %29 = vector.load %arg11[%c0_33, %c0_34] : memref<128x128xf32, #tpu.memory_space<vmem>>, vector<128x128xf32>
    tpu.vector_store %arg11[%c0_33, %c0_34], %28 {strides = array<i32>} : memref<128x128xf32, #tpu.memory_space<vmem>>, vector<128x128xf32>,
    %c0_35 = arith.constant 0 : index
    %c0_36 = arith.constant 0 : index
    %30 = vector.load %arg12[%c0_35, %c0_36] : memref<128x128xf32, #tpu.memory_space<vmem>>, vector<128x128xf32>
    tpu.vector_store %arg12[%c0_35, %c0_36], %7 {strides = array<i32>} : memref<128x128xf32, #tpu.memory_space<vmem>>, vector<128x128xf32>,
    %c0_37 = arith.constant 0 : index
    %c0_38 = arith.constant 0 : index
    %31 = vector.load %arg13[%c0_37, %c0_38] : memref<128x128xf32, #tpu.memory_space<vmem>>, vector<128x128xf32>
    tpu.vector_store %arg13[%c0_37, %c0_38], %9 {strides = array<i32>} : memref<128x128xf32, #tpu.memory_space<vmem>>, vector<128x128xf32>,
    return
  }
  func.func @transform_0(%arg0: i32) -> (i32, i32) {
    %c0_i32 = arith.constant 0 : i32
    %c0_i32_0 = arith.constant 0 : i32
    %c0_i32_1 = arith.constant 0 : i32
    return %c0_i32, %c0_i32_0 : i32, i32
  }
  func.func @transform_1(%arg0: i32) -> (i32, i32) {
    %c0_i32 = arith.constant 0 : i32
    %c0_i32_0 = arith.constant 0 : i32
    %c0_i32_1 = arith.constant 0 : i32
    return %c0_i32, %c0_i32_0 : i32, i32
  }
  func.func @transform_2(%arg0: i32) -> (i32, i32) {
    %c0_i32 = arith.constant 0 : i32
    %c0_i32_0 = arith.constant 0 : i32
    %c0_i32_1 = arith.constant 0 : i32
    return %c0_i32, %c0_i32_0 : i32, i32
  }
  func.func @transform_3(%arg0: i32) -> (i32, i32) {
    %c0_i32 = arith.constant 0 : i32
    %c0_i32_0 = arith.constant 0 : i32
    %c0_i32_1 = arith.constant 0 : i32
    return %c0_i32, %c0_i32_0 : i32, i32
  }
  func.func @transform_4(%arg0: i32) -> (i32, i32) {
    %c0_i32 = arith.constant 0 : i32
    %c0_i32_0 = arith.constant 0 : i32
    %c0_i32_1 = arith.constant 0 : i32
    return %c0_i32, %c0_i32_0 : i32, i32
  }
  func.func @transform_5(%arg0: i32) -> (i32, i32) {
    %c0_i32 = arith.constant 0 : i32
    %c0_i32_0 = arith.constant 0 : i32
    %c0_i32_1 = arith.constant 0 : i32
    return %c0_i32, %c0_i32_0 : i32, i32
  }
  func.func @transform_6(%arg0: i32) -> (i32, i32) {
    %c0_i32 = arith.constant 0 : i32
    %c0_i32_0 = arith.constant 0 : i32
    %c0_i32_1 = arith.constant 0 : i32
    return %c0_i32, %c0_i32_0 : i32, i32
  }
  func.func @transform_7(%arg0: i32) -> (i32, i32) {
    %c0_i32 = arith.constant 0 : i32
    %c0_i32_0 = arith.constant 0 : i32
    %c0_i32_1 = arith.constant 0 : i32
    return %c0_i32, %c0_i32_0 : i32, i32
  }
  func.func @transform_8(%arg0: i32) -> (i32, i32) {
    %c0_i32 = arith.constant 0 : i32
    %c0_i32_0 = arith.constant 0 : i32
    %c0_i32_1 = arith.constant 0 : i32
    return %c0_i32, %c0_i32_0 : i32, i32
  }
  func.func @transform_9(%arg0: i32) -> (i32, i32) {
    %c0_i32 = arith.constant 0 : i32
    %c0_i32_0 = arith.constant 0 : i32
    %c0_i32_1 = arith.constant 0 : i32
    return %c0_i32, %c0_i32_0 : i32, i32
  }
  func.func @transform_10(%arg0: i32) -> (i32, i32) {
    %c0_i32 = arith.constant 0 : i32
    %c0_i32_0 = arith.constant 0 : i32
    %c0_i32_1 = arith.constant 0 : i32
    return %c0_i32, %c0_i32_0 : i32, i32
  }
}

</mosaic_0001>

<bundles_post_ra>
// kernel: tpu_custom_call.1
= control target key start
LH: loop header
LB: loop body
LE: loop exit
PB: predicated region body
PF: predicated region fallthrough
CT: control target
= control target key end

     0   :  { %16 = vsyncpa [#allocation5], 0  ;;  %s3748_s0 = inlined_call_operand.hbm [shape: f32[128,128], index: 0, kind: input, shape index: {}]   ;;  %s3749_s1 = inlined_call_operand.hbm [shape: f32[128,128], index: 1, kind: input, shape index: {}]   ;;  %s3750_s2 = inlined_call_operand.hbm [shape: f32[128,128], index: 2, kind: input, shape index: {}]   ;;  %s3751_s3 = inlined_call_operand.hbm [shape: f32[128,128], index: 3, kind: input, shape index: {}]   ;;  %s3752_s4 = inlined_call_operand.hbm [shape: f32[128,128], index: 4, kind: input, shape index: {}]   ;;  %s3753_s5 = inlined_call_operand.hbm [shape: f32[128,128], index: 5, kind: input, shape index: {}]   ;;  %s3754_s6 = inlined_call_operand.hbm [shape: f32[128,128], index: 6, kind: input, shape index: {}]   ;;  %s3755_s7 = inlined_call_operand.hbm [shape: f32[128,128], index: 7, kind: output, shape index: {0}]   ;;  %s3756_s8 = inlined_call_operand.hbm [shape: f32[128,128], index: 8, kind: output, shape index: {1}]   ;;  %s3757_s9 = inlined_call_operand.hbm [shape: f32[128,128], index: 9, kind: output, shape index: {2}]   ;;  %s3758_s10 = inlined_call_operand.hbm [shape: f32[128,128], index: 10, kind: output, shape index: {3}]  }
   0x1   :  { %17 = vsyncpa [#allocation8], 0 }
   0x2   :  { %18 = vsyncpa [#allocation11], 0 }
   0x3   :  { %19 = vsyncpa [#allocation14], 0 }
   0x4   :  { %20 = vsyncpa [#allocation6], 0 }
   0x5   :  { %21 = vsyncpa [#allocation18], 0 }
   0x6   :  { %22 = vsyncpa [#allocation21], 0  ;;  %s3299_s13 = smov 0  }
   0x7 LB: > { %s3305_s14 = sadd.s32 4294967295, %s3226_s13   ;;  %p2033_p0 = scmp.ge.s32.totalorder %s3226_s13, 1  ;;  %s3226_s13 = sphi %s3299_s13, %s28_s13  }
   0x8   : > { %p264_p1 = scmp.lt.s32.totalorder %s3226_s13, 3  ;;  %p3759_p3 = scmp.eq.s32.totalorder %s3305_s14, 0 }
   0x9   : > { %s3228_s16 = smov [#allocation7]   ;;  %s3229_s18 = smov [#allocation10]  }
   0xa   : > { %p3311_p4 = pnand %p2033_p0, %p264_p1  ;;  %s289_s17 = sshll.u32 %s3228_s16, 4  ;;  %s3315_s17 = int_to_ptr.vmem [resolvable:$true] %s289_s17 }
   0xb   : > { %s315_s19 = sshll.u32 %s3229_s18, 4  ;;  %s3230_s21 = smov [#allocation13]   ;;  %s3319_s19 = int_to_ptr.vmem [resolvable:$true] %s315_s19 }
   0xc   : > { %s3761_s15 = scalar_select %p3311_p4, 1, 0 }
   0xd   : > { %p2824_p5 = pneg %p3311_p4  ;;  %s341_s22 = sshll.u32 %s3230_s21, 4  ;;  %s3327_s22 = int_to_ptr.vmem [resolvable:$true] %s341_s22 }
   0xe   : > { %s3231_s23 = smov [#allocation4]   ;;  %s2892_s27 = scalar_lea.hbm %s3749_s1, 2048 }
   0xf   : > { %p3323_p6 = pnand %p3759_p3, %p2824_p5  ;;  %s3329_s24 = sshll.u32 %s3231_s23, 4  ;;  %s277_s24 = int_to_ptr.vmem [resolvable:$true] %s3329_s24 }
  0x10   : > { %p2893_p7 = scmp.ne.s32.totalorder %s3749_s1, %s2892_s27  ;;  %p2899_p11 = scmp.lt.u32.totalorder %s2892_s27, %s3749_s1 }
  0x11   : > { %p3339_p8 = pneg %p3323_p6 }
  0x13   : > { %p2895_p9 = pnand %p3339_p8, %p2893_p7 }
  0x15   : > { %p2896_p10 = pneg %p2895_p9 }
  0x17   : > { %p2901_p12 = pnand %p2899_p11, %p2896_p10 }
  0x19   : > { %2904 = shalt.err (!%p2901_p12)
}
  0x1a   : > { %s2905_s16 = scalar_lea.vmem %s3315_s17, 2048  ;;  %p2913_p5 = scmp.lt.s32.totalorder %s3315_s17, %s3315_s17 }
  0x1b   : > { %p2906_p13 = scmp.ne.s32.totalorder %s3315_s17, %s2905_s16  ;;  %p2914_p2 = scmp.lt.s32.totalorder %s2905_s16, %s2905_s16 }
  0x1d   : > { %p2908_p0 = pnand %p2906_p13, %p3339_p8  ;;  %p2915_p7 = por %p2914_p2, %p2913_p5 }
  0x1f   : > { %p2909_p1 = pneg %p2908_p0 }
  0x21   : > { %p2916_p9 = pnand %p2915_p7, %p2909_p1 }
  0x23   : > { %2919 = shalt.err (!%p2916_p9)
}
  0x24   : > { %s3232_s18 = smov 128   ;;  %s3233_s21 = smov 8  }
  0x25   : > { %2830 = dma.hbm_to_vmem [thread:$0]  (!%p3323_p6), %s3749_s1, 2048, %s3315_s17, [#allocation8], %s3232_s18, %s3232_s18, %s3233_s21  }
  0x26   : > { %s2920_s28 = scalar_lea.hbm %s3751_s3, 2048 }
  0x27   : > { %p2921_p2 = scmp.ne.s32.totalorder %s3751_s3, %s2920_s28  ;;  %p2927_p12 = scmp.lt.u32.totalorder %s2920_s28, %s3751_s3 }
  0x29   : > { %p2923_p10 = pnand %p2921_p2, %p3339_p8 }
  0x2b   : > { %p2924_p11 = pneg %p2923_p10 }
  0x2d   : > { %p2929_p13 = pnand %p2927_p12, %p2924_p11 }
  0x2f   : > { %2932 = shalt.err (!%p2929_p13)
}
  0x30   : > { %s2933_s17 = scalar_lea.vmem %s3319_s19, 2048  ;;  %p2941_p7 = scmp.lt.s32.totalorder %s3319_s19, %s3319_s19 }
  0x31   : > { %p2934_p0 = scmp.ne.s32.totalorder %s3319_s19, %s2933_s17  ;;  %p2942_p9 = scmp.lt.s32.totalorder %s2933_s17, %s2933_s17 }
  0x33   : > { %p2936_p1 = pnand %p2934_p0, %p3339_p8  ;;  %p2943_p2 = por %p2942_p9, %p2941_p7 }
  0x35   : > { %p2937_p5 = pneg %p2936_p1 }
  0x37   : > { %p2944_p10 = pnand %p2943_p2, %p2937_p5 }
  0x39   : > { %2947 = shalt.err (!%p2944_p10)
}
  0x3a   : > { %2836 = dma.hbm_to_vmem [thread:$0]  (!%p3323_p6), %s3751_s3, 2048, %s3319_s19, [#allocation11], %s3232_s18, %s3232_s18, %s3233_s21  }
  0x3b   : > { %s2948_s28 = scalar_lea.hbm %s3753_s5, 2048 }
  0x3c   : > { %p2949_p11 = scmp.ne.s32.totalorder %s3753_s5, %s2948_s28  ;;  %p2955_p0 = scmp.lt.u32.totalorder %s2948_s28, %s3753_s5 }
  0x3e   : > { %p2951_p12 = pnand %p2949_p11, %p3339_p8 }
  0x40   : > { %p2952_p13 = pneg %p2951_p12 }
  0x42   : > { %p2957_p1 = pnand %p2955_p0, %p2952_p13 }
  0x44   : > { %2960 = shalt.err (!%p2957_p1)
}
  0x45   : > { %s2961_s19 = scalar_lea.vmem %s3327_s22, 2048  ;;  %p2969_p2 = scmp.lt.s32.totalorder %s3327_s22, %s3327_s22 }
  0x46   : > { %p2962_p5 = scmp.ne.s32.totalorder %s3327_s22, %s2961_s19  ;;  %p2970_p10 = scmp.lt.s32.totalorder %s2961_s19, %s2961_s19 }
  0x48   : > { %p2964_p7 = pnand %p2962_p5, %p3339_p8  ;;  %p2971_p11 = por %p2970_p10, %p2969_p2 }
  0x4a   : > { %p2965_p9 = pneg %p2964_p7 }
  0x4c   : > { %p2972_p12 = pnand %p2971_p11, %p2965_p9 }
  0x4e   : > { %2975 = shalt.err (!%p2972_p12)
}
  0x4f   : > { %2842 = dma.hbm_to_vmem [thread:$0]  (!%p3323_p6), %s3753_s5, 2048, %s3327_s22, [#allocation14], %s3232_s18, %s3232_s18, %s3233_s21  }
  0x50   : > { %s2976_s27 = scalar_lea.hbm %s3748_s0, 2048 }
  0x51   : > { %p2977_p13 = scmp.ne.s32.totalorder %s3748_s0, %s2976_s27  ;;  %p2983_p5 = scmp.lt.u32.totalorder %s2976_s27, %s3748_s0 }
  0x53   : > { %p2979_p0 = pnand %p2977_p13, %p3339_p8 }
  0x55   : > { %p2980_p1 = pneg %p2979_p0 }
  0x57   : > { %p2985_p7 = pnand %p2983_p5, %p2980_p1 }
  0x59   : > { %2988 = shalt.err (!%p2985_p7)
}
  0x5a   : > { %s2989_s16 = scalar_lea.vmem %s277_s24, 2048  ;;  %p2997_p11 = scmp.lt.s32.totalorder %s277_s24, %s277_s24 }
  0x5b   : > { %p2990_p9 = scmp.ne.s32.totalorder %s277_s24, %s2989_s16  ;;  %p2998_p12 = scmp.lt.s32.totalorder %s2989_s16, %s2989_s16 }
  0x5d   : > { %p2992_p2 = pnand %p2990_p9, %p3339_p8  ;;  %p2999_p3 = por %p2998_p12, %p2997_p11 }
  0x5f   : > { %p2993_p10 = pneg %p2992_p2 }
  0x61   : > { %p3000_p4 = pnand %p2999_p3, %p2993_p10 }
  0x63   : > { %3003 = shalt.err (!%p3000_p4)
}
  0x64   : > { %2827 = dma.hbm_to_vmem [thread:$0]  (!%p3323_p6), %s3748_s0, 2048, %s277_s24, [#allocation5], %s3232_s18, %s3232_s18, %s3233_s21  }
  0x65   : > { %s3234_s17 = smov [#allocation9]   ;;  %s3235_s25 = smov [#allocation12]  }
  0x66   : > { %s302_s23 = sshll.u32 %s3234_s17, 4  ;;  %s328_s26 = sshll.u32 %s3235_s25, 4  ;;  %s303_s23 = int_to_ptr.vmem [resolvable:$true] %s302_s23  ;;  %s329_s26 = int_to_ptr.vmem [resolvable:$true] %s328_s26 }
  0x67   : > { %s3004_s29 = scalar_lea.hbm %s3750_s2, 2048 }
  0x68   : > { %p3005_p3 = scmp.ne.s32.totalorder %s3750_s2, %s3004_s29  ;;  %p3011_p0 = scmp.lt.u32.totalorder %s3004_s29, %s3750_s2 }
  0x6a   : > { %p3007_p4 = pnand %p3005_p3, %p3339_p8 }
  0x6c   : > { %p3008_p13 = pneg %p3007_p4 }
  0x6e   : > { %p3013_p1 = pnand %p3011_p0, %p3008_p13 }
  0x70   : > { %3016 = shalt.err (!%p3013_p1)
}
  0x71   : > { %s3017_s24 = scalar_lea.vmem %s303_s23, 2048  ;;  %p3025_p2 = scmp.lt.s32.totalorder %s303_s23, %s303_s23 }
  0x72   : > { %p3018_p5 = scmp.ne.s32.totalorder %s303_s23, %s3017_s24  ;;  %p3026_p10 = scmp.lt.s32.totalorder %s3017_s24, %s3017_s24 }
  0x74   : > { %p3020_p7 = pnand %p3018_p5, %p3339_p8  ;;  %p3027_p11 = por %p3026_p10, %p3025_p2 }
  0x76   : > { %p3021_p9 = pneg %p3020_p7 }
  0x78   : > { %p3028_p12 = pnand %p3027_p11, %p3021_p9 }
  0x7a   : > { %3031 = shalt.err (!%p3028_p12)
}
  0x7b   : > { %2833 = dma.hbm_to_vmem [thread:$0]  (!%p3323_p6), %s3750_s2, 2048, %s303_s23, [#allocation8], %s3232_s18, %s3232_s18, %s3233_s21  }
  0x7c   : > { %s3032_s28 = scalar_lea.hbm %s3752_s4, 2048 }
  0x7d   : > { %p3033_p3 = scmp.ne.s32.totalorder %s3752_s4, %s3032_s28  ;;  %p3039_p0 = scmp.lt.u32.totalorder %s3032_s28, %s3752_s4 }
  0x7f   : > { %p3035_p4 = pnand %p3033_p3, %p3339_p8 }
  0x81   : > { %p3036_p13 = pneg %p3035_p4 }
  0x83   : > { %p3041_p1 = pnand %p3039_p0, %p3036_p13 }
  0x85   : > { %3044 = shalt.err (!%p3041_p1)
}
  0x86   : > { %s3045_s22 = scalar_lea.vmem %s329_s26, 2048  ;;  %p3053_p2 = scmp.lt.s32.totalorder %s329_s26, %s329_s26 }
  0x87   : > { %p3046_p5 = scmp.ne.s32.totalorder %s329_s26, %s3045_s22  ;;  %p3054_p10 = scmp.lt.s32.totalorder %s3045_s22, %s3045_s22 }
  0x89   : > { %p3048_p7 = pnand %p3046_p5, %p3339_p8  ;;  %p3055_p11 = por %p3054_p10, %p3053_p2 }
  0x8b   : > { %p3049_p9 = pneg %p3048_p7 }
  0x8d   : > { %p3056_p12 = pnand %p3055_p11, %p3049_p9 }
  0x8f   : > { %3059 = shalt.err (!%p3056_p12)
}
  0x90   : > { %2839 = dma.hbm_to_vmem [thread:$0]  (!%p3323_p6), %s3752_s4, 2048, %s329_s26, [#allocation11], %s3232_s18, %s3232_s18, %s3233_s21  }
  0x91   : > { %s3236_s19 = smov [#allocation15]   ;;  %s3060_s28 = scalar_lea.hbm %s3754_s6, 2048 }
  0x92   : > { %s354_s17 = sshll.u32 %s3236_s19, 4  ;;  %p3061_p3 = scmp.ne.s32.totalorder %s3754_s6, %s3060_s28  ;;  %s355_s17 = int_to_ptr.vmem [resolvable:$true] %s354_s17 }
  0x93   : > { %p3067_p0 = scmp.lt.u32.totalorder %s3060_s28, %s3754_s6 }
  0x94   : > { %p3063_p4 = pnand %p3061_p3, %p3339_p8 }
  0x96   : > { %p3064_p13 = pneg %p3063_p4 }
  0x98   : > { %p3069_p1 = pnand %p3067_p0, %p3064_p13 }
  0x9a   : > { %3072 = shalt.err (!%p3069_p1)
}
  0x9b   : > { %s3073_s26 = scalar_lea.vmem %s355_s17, 2048  ;;  %p3081_p2 = scmp.lt.s32.totalorder %s355_s17, %s355_s17 }
  0x9c   : > { %p3074_p5 = scmp.ne.s32.totalorder %s355_s17, %s3073_s26  ;;  %p3082_p10 = scmp.lt.s32.totalorder %s3073_s26, %s3073_s26 }
  0x9e   : > { %p3076_p7 = pnand %p3074_p5, %p3339_p8  ;;  %p3083_p11 = por %p3082_p10, %p3081_p2 }
  0xa0   : > { %p3077_p9 = pneg %p3076_p7 }
  0xa2   : > { %p3084_p12 = pnand %p3083_p11, %p3077_p9 }
  0xa4   : > { %3087 = shalt.err (!%p3084_p12)
}
  0xa5   : > { %2845 = dma.hbm_to_vmem [thread:$0]  (!%p3323_p6), %s3754_s6, 2048, %s355_s17, [#allocation14], %s3232_s18, %s3232_s18, %s3233_s21  }
  0xa6   : > { %p3764_p3 = scmp.ne.s32.totalorder %s3761_s15, 0 }
  0xa7   : > { %p3765_p8 = scmp.eq.s32.totalorder (!%p3764_p3), %s3305_s14, 0 }
  0xa8   : > { %370 = sbr.rel (%p3764_p3) target bundleno = 853 (0x355), region = 48 }
  0xaf   : > { %3197 = dma.done.wait (%p3765_p8), [#allocation5], 2048   ;;  %p3766_p4 = pmov %p3765_p8 }
  0xb1   : > { %3199 = vsyncadd (%p3766_p4), [#allocation5], 4294965248  ;;  %p3767_p13 = pmov %p3766_p4 }
  0xb2   : > { %p3768_p0 = pmov %p3766_p4 }
  0xb3   : > { %3201 = dma.done.wait (%p3767_p13), [#allocation8], 4096  }
  0xb4   : > { %3203 = vsyncadd (%p3768_p0), [#allocation8], 4294963200  ;;  %p3769_p1 = pmov %p3768_p0 }
  0xb5   : > { %p3770_p6 = pmov %p3768_p0 }
  0xb6   : > { %3205 = dma.done.wait (%p3769_p1), [#allocation11], 4096  }
  0xb7   : > { %3207 = vsyncadd (%p3770_p6), [#allocation11], 4294963200  ;;  %p3771_p5 = pmov %p3768_p0 }
  0xb8   : > { %p3772_p7 = pmov %p3768_p0 }
  0xb9   : > { %3209 = dma.done.wait (%p3771_p5), [#allocation14], 4096  }
  0xba   : > { %3211 = vsyncadd (%p3772_p7), [#allocation14], 4294963200  ;;  %p3773_p9 = scmp.ne.s32.totalorder %s3305_s14, 0 }
  0xbb   : > { %v426_v0 = vld [vmem:[#allocation13] sm:$0xff] (!%p3773_p9)  ;;  %v427_v1 = vld [vmem:[#allocation13 + $0x8] sm:$0xff] (!%p3773_p9)  ;;  %v428_v2 = vld [vmem:[#allocation13 + $0x10] sm:$0xff] (!%p3773_p9)  ;;  %v3237_v6 = vmov (!%p3773_p9), 0.0  }
  0xbc   : > { %425 = sbr.rel (%p3773_p9) target bundleno = 236 (0xec), region = 80  ;;  %442 = vst [vmem:[#allocation2] sm:$0xff] (!%p3773_p9), %v426_v0  ;;  %443 = vst [vmem:[#allocation2 + $0x8] sm:$0xff] (!%p3773_p9), %v427_v1  ;;  %v429_v3 = vld [vmem:[#allocation13 + $0x18] sm:$0xff] (!%p3773_p9)  ;;  %v430_v4 = vld [vmem:[#allocation13 + $0x20] sm:$0xff] (!%p3773_p9) }
  0xbd   : > { %444 = vst [vmem:[#allocation2 + $0x10] sm:$0xff] (!%p3773_p9), %v428_v2  ;;  %v431_v5 = vld [vmem:[#allocation13 + $0x28] sm:$0xff] (!%p3773_p9)  ;;  %506 = vst [vmem:[#allocation16] sm:$0xff] (!%p3773_p9), %v426_v0  ;;  %v432_v7 = vld [vmem:[#allocation13 + $0x30] sm:$0xff] (!%p3773_p9) }
  0xbe   : > { %507 = vst [vmem:[#allocation16 + $0x8] sm:$0xff] (!%p3773_p9), %v427_v1  ;;  %508 = vst [vmem:[#allocation16 + $0x10] sm:$0xff] (!%p3773_p9), %v428_v2  ;;  %v433_v8 = vld [vmem:[#allocation13 + $0x38] sm:$0xff] (!%p3773_p9)  ;;  %v434_v9 = vld [vmem:[#allocation13 + $0x40] sm:$0xff] (!%p3773_p9) }
  0xbf   : > { %554 = vst [vmem:[#allocation19] sm:$0xff] (!%p3773_p9), %v3237_v6  ;;  %555 = vst [vmem:[#allocation19 + $0x8] sm:$0xff] (!%p3773_p9), %v3237_v6  ;;  %v435_v10 = vld [vmem:[#allocation13 + $0x48] sm:$0xff] (!%p3773_p9)  ;;  %v436_v11 = vld [vmem:[#allocation13 + $0x50] sm:$0xff] (!%p3773_p9) }
  0xc0   : > { %556 = vst [vmem:[#allocation19 + $0x10] sm:$0xff] (!%p3773_p9), %v3237_v6  ;;  %557 = vst [vmem:[#allocation19 + $0x18] sm:$0xff] (!%p3773_p9), %v3237_v6  ;;  %v437_v12 = vld [vmem:[#allocation13 + $0x58] sm:$0xff] (!%p3773_p9)  ;;  %v438_v13 = vld [vmem:[#allocation13 + $0x60] sm:$0xff] (!%p3773_p9) }
  0xc1   : > { %558 = vst [vmem:[#allocation19 + $0x20] sm:$0xff] (!%p3773_p9), %v3237_v6  ;;  %559 = vst [vmem:[#allocation19 + $0x28] sm:$0xff] (!%p3773_p9), %v3237_v6  ;;  %v439_v14 = vld [vmem:[#allocation13 + $0x68] sm:$0xff] (!%p3773_p9)  ;;  %v440_v15 = vld [vmem:[#allocation13 + $0x70] sm:$0xff] (!%p3773_p9) }
  0xc2   : > { %560 = vst [vmem:[#allocation19 + $0x30] sm:$0xff] (!%p3773_p9), %v3237_v6  ;;  %561 = vst [vmem:[#allocation19 + $0x38] sm:$0xff] (!%p3773_p9), %v3237_v6  ;;  %v441_v16 = vld [vmem:[#allocation13 + $0x78] sm:$0xff] (!%p3773_p9)  ;;  %v458_v17 = vld [vmem:[#allocation15] sm:$0xff] (!%p3773_p9) }
  0xc3   : > { %562 = vst [vmem:[#allocation19 + $0x40] sm:$0xff] %v3237_v6  ;;  %563 = vst [vmem:[#allocation19 + $0x48] sm:$0xff] %v3237_v6  ;;  %v459_v18 = vld [vmem:[#allocation15 + $0x8] sm:$0xff]  ;;  %v460_v19 = vld [vmem:[#allocation15 + $0x10] sm:$0xff] }
  0xc4   : > { %564 = vst [vmem:[#allocation19 + $0x50] sm:$0xff] %v3237_v6  ;;  %565 = vst [vmem:[#allocation19 + $0x58] sm:$0xff] %v3237_v6  ;;  %v461_v20 = vld [vmem:[#allocation15 + $0x18] sm:$0xff]  ;;  %v462_v21 = vld [vmem:[#allocation15 + $0x20] sm:$0xff] }
  0xc5   : > { %566 = vst [vmem:[#allocation19 + $0x60] sm:$0xff] %v3237_v6  ;;  %567 = vst [vmem:[#allocation19 + $0x68] sm:$0xff] %v3237_v6  ;;  %v463_v22 = vld [vmem:[#allocation15 + $0x28] sm:$0xff]  ;;  %v464_v23 = vld [vmem:[#allocation15 + $0x30] sm:$0xff] }
  0xc6   : > { %568 = vst [vmem:[#allocation19 + $0x70] sm:$0xff] %v3237_v6  ;;  %569 = vst [vmem:[#allocation19 + $0x78] sm:$0xff] %v3237_v6  ;;  %v465_v24 = vld [vmem:[#allocation15 + $0x38] sm:$0xff]  ;;  %v466_v25 = vld [vmem:[#allocation15 + $0x40] sm:$0xff] }
  0xc7   : > { %570 = vst [vmem:[#allocation20] sm:$0xff] %v3237_v6  ;;  %571 = vst [vmem:[#allocation20 + $0x8] sm:$0xff] %v3237_v6  ;;  %v467_v26 = vld [vmem:[#allocation15 + $0x48] sm:$0xff]  ;;  %v468_v27 = vld [vmem:[#allocation15 + $0x50] sm:$0xff] }
  0xc8   : > { %572 = vst [vmem:[#allocation20 + $0x10] sm:$0xff] %v3237_v6  ;;  %573 = vst [vmem:[#allocation20 + $0x18] sm:$0xff] %v3237_v6  ;;  %v469_v28 = vld [vmem:[#allocation15 + $0x58] sm:$0xff]  ;;  %v470_v29 = vld [vmem:[#allocation15 + $0x60] sm:$0xff] }
  0xc9   : > { %574 = vst [vmem:[#allocation20 + $0x20] sm:$0xff] %v3237_v6  ;;  %575 = vst [vmem:[#allocation20 + $0x28] sm:$0xff] %v3237_v6  ;;  %v471_v30 = vld [vmem:[#allocation15 + $0x68] sm:$0xff]  ;;  %v472_v31 = vld [vmem:[#allocation15 + $0x70] sm:$0xff] }
  0xca   : > { %576 = vst [vmem:[#allocation20 + $0x30] sm:$0xff] %v3237_v6  ;;  %577 = vst [vmem:[#allocation20 + $0x38] sm:$0xff] %v3237_v6  ;;  %v473_v32 = vld [vmem:[#allocation15 + $0x78] sm:$0xff] }
  0xcb   : > { %578 = vst [vmem:[#allocation20 + $0x40] sm:$0xff] %v3237_v6  ;;  %579 = vst [vmem:[#allocation20 + $0x48] sm:$0xff] %v3237_v6 }
  0xcc   : > { %580 = vst [vmem:[#allocation20 + $0x50] sm:$0xff] %v3237_v6  ;;  %581 = vst [vmem:[#allocation20 + $0x58] sm:$0xff] %v3237_v6 }
  0xcd   : > { %582 = vst [vmem:[#allocation20 + $0x60] sm:$0xff] %v3237_v6  ;;  %583 = vst [vmem:[#allocation20 + $0x68] sm:$0xff] %v3237_v6 }
  0xce   : > { %584 = vst [vmem:[#allocation20 + $0x70] sm:$0xff] %v3237_v6  ;;  %585 = vst [vmem:[#allocation20 + $0x78] sm:$0xff] %v3237_v6 }
  0xcf   : > { %445 = vst [vmem:[#allocation2 + $0x18] sm:$0xff] %v429_v3  ;;  %446 = vst [vmem:[#allocation2 + $0x20] sm:$0xff] %v430_v4 }
  0xd0   : > { %447 = vst [vmem:[#allocation2 + $0x28] sm:$0xff] %v431_v5  ;;  %509 = vst [vmem:[#allocation16 + $0x18] sm:$0xff] %v429_v3 }
  0xd1   : > { %510 = vst [vmem:[#allocation16 + $0x20] sm:$0xff] %v430_v4  ;;  %511 = vst [vmem:[#allocation16 + $0x28] sm:$0xff] %v431_v5 }
  0xd2   : > { %448 = vst [vmem:[#allocation2 + $0x30] sm:$0xff] %v432_v7  ;;  %449 = vst [vmem:[#allocation2 + $0x38] sm:$0xff] %v433_v8 }
  0xd3   : > { %450 = vst [vmem:[#allocation2 + $0x40] sm:$0xff] %v434_v9  ;;  %512 = vst [vmem:[#allocation16 + $0x30] sm:$0xff] %v432_v7 }
  0xd4   : > { %513 = vst [vmem:[#allocation16 + $0x38] sm:$0xff] %v433_v8  ;;  %514 = vst [vmem:[#allocation16 + $0x40] sm:$0xff] %v434_v9 }
  0xd5   : > { %451 = vst [vmem:[#allocation2 + $0x48] sm:$0xff] %v435_v10  ;;  %452 = vst [vmem:[#allocation2 + $0x50] sm:$0xff] %v436_v11 }
  0xd6   : > { %453 = vst [vmem:[#allocation2 + $0x58] sm:$0xff] %v437_v12  ;;  %515 = vst [vmem:[#allocation16 + $0x48] sm:$0xff] %v435_v10 }
  0xd7   : > { %516 = vst [vmem:[#allocation16 + $0x50] sm:$0xff] %v436_v11  ;;  %517 = vst [vmem:[#allocation16 + $0x58] sm:$0xff] %v437_v12 }
  0xd8   : > { %454 = vst [vmem:[#allocation2 + $0x60] sm:$0xff] %v438_v13  ;;  %455 = vst [vmem:[#allocation2 + $0x68] sm:$0xff] %v439_v14 }
  0xd9   : > { %456 = vst [vmem:[#allocation2 + $0x70] sm:$0xff] %v440_v15  ;;  %518 = vst [vmem:[#allocation16 + $0x60] sm:$0xff] %v438_v13 }
  0xda   : > { %519 = vst [vmem:[#allocation16 + $0x68] sm:$0xff] %v439_v14  ;;  %520 = vst [vmem:[#allocation16 + $0x70] sm:$0xff] %v440_v15 }
  0xdb   : > { %457 = vst [vmem:[#allocation2 + $0x78] sm:$0xff] %v441_v16  ;;  %474 = vst [vmem:[#allocation3] sm:$0xff] %v458_v17 }
  0xdc   : > { %475 = vst [vmem:[#allocation3 + $0x8] sm:$0xff] %v459_v18  ;;  %521 = vst [vmem:[#allocation16 + $0x78] sm:$0xff] %v441_v16 }
  0xdd   : > { %538 = vst [vmem:[#allocation17] sm:$0xff] %v458_v17  ;;  %539 = vst [vmem:[#allocation17 + $0x8] sm:$0xff] %v459_v18 }
  0xde   : > { %476 = vst [vmem:[#allocation3 + $0x10] sm:$0xff] %v460_v19  ;;  %477 = vst [vmem:[#allocation3 + $0x18] sm:$0xff] %v461_v20 }
  0xdf   : > { %478 = vst [vmem:[#allocation3 + $0x20] sm:$0xff] %v462_v21  ;;  %540 = vst [vmem:[#allocation17 + $0x10] sm:$0xff] %v460_v19 }
  0xe0   : > { %541 = vst [vmem:[#allocation17 + $0x18] sm:$0xff] %v461_v20  ;;  %542 = vst [vmem:[#allocation17 + $0x20] sm:$0xff] %v462_v21 }
  0xe1   : > { %479 = vst [vmem:[#allocation3 + $0x28] sm:$0xff] %v463_v22  ;;  %480 = vst [vmem:[#allocation3 + $0x30] sm:$0xff] %v464_v23 }
  0xe2   : > { %481 = vst [vmem:[#allocation3 + $0x38] sm:$0xff] %v465_v24  ;;  %543 = vst [vmem:[#allocation17 + $0x28] sm:$0xff] %v463_v22 }
  0xe3   : > { %544 = vst [vmem:[#allocation17 + $0x30] sm:$0xff] %v464_v23  ;;  %545 = vst [vmem:[#allocation17 + $0x38] sm:$0xff] %v465_v24 }
  0xe4   : > { %482 = vst [vmem:[#allocation3 + $0x40] sm:$0xff] %v466_v25  ;;  %483 = vst [vmem:[#allocation3 + $0x48] sm:$0xff] %v467_v26 }
  0xe5   : > { %484 = vst [vmem:[#allocation3 + $0x50] sm:$0xff] %v468_v27  ;;  %546 = vst [vmem:[#allocation17 + $0x40] sm:$0xff] %v466_v25 }
  0xe6   : > { %547 = vst [vmem:[#allocation17 + $0x48] sm:$0xff] %v467_v26  ;;  %548 = vst [vmem:[#allocation17 + $0x50] sm:$0xff] %v468_v27 }
  0xe7   : > { %485 = vst [vmem:[#allocation3 + $0x58] sm:$0xff] %v469_v28  ;;  %486 = vst [vmem:[#allocation3 + $0x60] sm:$0xff] %v470_v29 }
  0xe8   : > { %487 = vst [vmem:[#allocation3 + $0x68] sm:$0xff] %v471_v30  ;;  %549 = vst [vmem:[#allocation17 + $0x58] sm:$0xff] %v469_v28 }
  0xe9   : > { %550 = vst [vmem:[#allocation17 + $0x60] sm:$0xff] %v470_v29  ;;  %551 = vst [vmem:[#allocation17 + $0x68] sm:$0xff] %v471_v30 }
  0xea   : > { %488 = vst [vmem:[#allocation3 + $0x70] sm:$0xff] %v472_v31  ;;  %489 = vst [vmem:[#allocation3 + $0x78] sm:$0xff] %v473_v32 }
  0xeb   : > { %552 = vst [vmem:[#allocation17 + $0x70] sm:$0xff] %v472_v31  ;;  %553 = vst [vmem:[#allocation17 + $0x78] sm:$0xff] %v473_v32 }
  0xec PF: > { %v602_v33 = vld [vmem:[#allocation3] sm:$0xff]  ;;  %v603_v34 = vld [vmem:[#allocation3 + $0x8] sm:$0xff]  ;;  %v604_v35 = vld [vmem:[#allocation3 + $0x10] sm:$0xff]  ;;  %p2860_p2 = scmp.eq.s32.totalorder %s3305_s14, 1  ;;  %s3238_s15 = smov [#allocation16]  }
  0xed   : > { %v3520_v36 = vpack.c.bf16 %v603_v34, %v602_v33  ;;  %v605_v37 = vld [vmem:[#allocation3 + $0x18] sm:$0xff]  ;;  %v606_v39 = vld [vmem:[#allocation3 + $0x20] sm:$0xff]  ;;  %v607_v40 = vld [vmem:[#allocation3 + $0x28] sm:$0xff]  ;;  %s1862_s20 = sshll.u32 %s3238_s15, 4  ;;  %s1863_s20 = int_to_ptr.vmem [resolvable:$true] %s1862_s20 }
  0xee   : > { %v3522_v38 = vpack.c.bf16 %v605_v37, %v604_v35  ;;  %v3527_v41 = vpack.c.bf16 %v607_v40, %v606_v39  ;;  %v608_v42 = vld [vmem:[#allocation3 + $0x30] sm:$0xff]  ;;  %v618_v43 = vld [vmem:[#allocation4] sm:$0xff]  ;;  %v3529_v44 = vld [vmem:[#allocation4 + $0x8] sm:$0xff]  ;;  %s3088_s30 = scalar_lea.vmem %s1863_s20, 2048  ;;  %p3095_p3 = scmp.lt.s32.totalorder %s1863_s20, %s1863_s20 }
  0xef   : > { %2589 = vmatprep.subr.bf16.mxu0 %v3520_v36  ;;  %v609_v45 = vld [vmem:[#allocation3 + $0x38] sm:$0xff]  ;;  %2284 = vmatprep.mubr.f32.mxu0 %v618_v43  ;;  %v3531_v46 = vld [vmem:[#allocation4 + $0x10] sm:$0xff]  ;;  %v2620_v48 = vpack.c.bf16 %v3529_v44, %v618_v43  ;;  %v3539_v50 = vld [vmem:[#allocation2] sm:$0xff]  ;;  %p3089_p10 = scmp.ne.s32.totalorder %s1863_s20, %s3088_s30  ;;  %p3096_p8 = scmp.lt.s32.totalorder %s3088_s30, %s3088_s30 }
  0xf0   : > { %2591 = vmatpush3.bf16.msra.mxu0 %v3520_v36  ;;  %v3533_v47 = vld [vmem:[#allocation4 + $0x18] sm:$0xff]  ;;  %v3542_v51 = vpack.c.bf16 %v609_v45, %v608_v42  ;;  %v610_v52 = vld [vmem:[#allocation3 + $0x40] sm:$0xff]  ;;  %v611_v53 = vld [vmem:[#allocation3 + $0x48] sm:$0xff]  ;;  %634 = vxpose.xlu0.b32.start [1/16] %v3539_v50, 128 }
  0xf1   : > { %2593 = vmatprep.subr.bf16.mxu0 %v3522_v38  ;;  %v2624_v49 = vpack.c.bf16 %v3533_v47, %v3531_v46  ;;  %2621 = vmatprep.subr.bf16.mxu1 %v2620_v48  ;;  %v3545_v54 = vld [vmem:[#allocation4 + $0x20] sm:$0xff]  ;;  %v3547_v55 = vld [vmem:[#allocation4 + $0x28] sm:$0xff]  ;;  %v3555_v58 = vpack.c.bf16 %v611_v53, %v610_v52  ;;  %v612_v59 = vld [vmem:[#allocation3 + $0x50] sm:$0xff]  ;;  %p3090_p11 = pnand %p3089_p10, %p2860_p2  ;;  %p3097_p4 = por %p3096_p8, %p3095_p3 }
  0xf2   : > { %v3549_v56 = vld [vmem:[#allocation2 + $0x8] sm:$0xff]  ;;  %2623 = vmatpush3.bf16.msra.mxu1 %v2620_v48  ;;  %v2628_v57 = vpack.c.bf16 %v3547_v55, %v3545_v54  ;;  %v613_v60 = vld [vmem:[#allocation3 + $0x58] sm:$0xff]  ;;  %v3558_v61 = vld [vmem:[#allocation4 + $0x30] sm:$0xff] }
  0xf3   : > { %2625 = vmatprep.subr.bf16.mxu1 %v2624_v49  ;;  %v3560_v62 = vld [vmem:[#allocation4 + $0x38] sm:$0xff]  ;;  %v3562_v63 = vld [vmem:[#allocation2 + $0x10] sm:$0xff]  ;;  %v3568_v1 = vpack.c.bf16 %v613_v60, %v612_v59  ;;  %v614_v2 = vld [vmem:[#allocation3 + $0x60] sm:$0xff]  ;;  %v2716_v32 = vpack.c.bf16 %v3549_v56, %v3539_v50  ;;  %p3091_p12 = pneg %p3090_p11 }
  0xf4   : > { %2595 = vmatpush3.bf16.msra.mxu0 %v3522_v38  ;;  %635 = vxpose.xlu0.b32.cont [2/16] %v3549_v56, 128  ;;  %v2632_v0 = vpack.c.bf16 %v3560_v62, %v3558_v61  ;;  %v615_v3 = vld [vmem:[#allocation3 + $0x68] sm:$0xff]  ;;  %v3571_v4 = vld [vmem:[#allocation4 + $0x40] sm:$0xff]  ;;  %v3575_v6 = vld [vmem:[#allocation2 + $0x18] sm:$0xff] }
  0xf5   : > { %2597 = vmatprep.subr.bf16.mxu0 %v3527_v41  ;;  %v3573_v5 = vld [vmem:[#allocation4 + $0x48] sm:$0xff]  ;;  %v3581_v8 = vpack.c.bf16 %v615_v3, %v614_v2  ;;  %v616_v9 = vld [vmem:[#allocation3 + $0x70] sm:$0xff]  ;;  %v617_v10 = vld [vmem:[#allocation3 + $0x78] sm:$0xff]  ;;  %p3098_p13 = pnand %p3097_p4, %p3091_p12 }
  0xf6   : > { %2627 = vmatpush3.bf16.msra.mxu1 %v2624_v49  ;;  %v2636_v7 = vpack.c.bf16 %v3573_v5, %v3571_v4  ;;  %v628_v11 = vld [vmem:[#allocation4 + $0x50] sm:$0xff]  ;;  %v629_v12 = vld [vmem:[#allocation4 + $0x58] sm:$0xff]  ;;  %v3584_v13 = vld [vmem:[#allocation2 + $0x20] sm:$0xff]  ;;  %v3588_v15 = vpack.c.bf16 %v617_v10, %v616_v9 }
  0xf7   : > { %2629 = vmatprep.subr.bf16.mxu1 %v2628_v57  ;;  %v2640_v14 = vpack.c.bf16 %v629_v12, %v628_v11  ;;  %v630_v16 = vld [vmem:[#allocation4 + $0x60] sm:$0xff]  ;;  %v631_v17 = vld [vmem:[#allocation4 + $0x68] sm:$0xff]  ;;  %v632_v20 = vld [vmem:[#allocation4 + $0x70] sm:$0xff] }
  0xf8   : > { %2599 = vmatpush3.bf16.msra.mxu0 %v3527_v41  ;;  %636 = vxpose.xlu0.b32.cont [3/16] %v3562_v63, 128  ;;  %v3591_v18 = vld [vmem:[#allocation2 + $0x28] sm:$0xff]  ;;  %v2644_v19 = vpack.c.bf16 %v631_v17, %v630_v16  ;;  %v633_v21 = vld [vmem:[#allocation4 + $0x78] sm:$0xff]  ;;  %v3596_v22 = vld [vmem:[#allocation2 + $0x30] sm:$0xff] }
  0xf9   : > { %2601 = vmatprep.subr.bf16.mxu0 %v3542_v51  ;;  %v2648_v23 = vpack.c.bf16 %v633_v21, %v632_v20  ;;  %v3601_v24 = vld [vmem:[#allocation2 + $0x38] sm:$0xff]  ;;  %v3608_v25 = vld [vmem:[#allocation2 + $0x40] sm:$0xff]  ;;  %v3615_v26 = vld [vmem:[#allocation2 + $0x48] sm:$0xff]  ;;  %v2724_v40 = vpack.c.bf16 %v3591_v18, %v3584_v13 }
  0xfa   : > { %2631 = vmatpush3.bf16.msra.mxu1 %v2628_v57  ;;  %v3622_v27 = vld [vmem:[#allocation2 + $0x50] sm:$0xff]  ;;  %v597_v28 = vld [vmem:[#allocation2 + $0x58] sm:$0xff]  ;;  %v598_v29 = vld [vmem:[#allocation2 + $0x60] sm:$0xff]  ;;  %v2728_v43 = vpack.c.bf16 %v3601_v24, %v3596_v22 }
  0xfb   : > { %2633 = vmatprep.subr.bf16.mxu1 %v2632_v0  ;;  %v599_v30 = vld [vmem:[#allocation2 + $0x68] sm:$0xff]  ;;  %v988_v31 = vld [vmem:[#allocation12] sm:$0xff]  ;;  %v600_v34 = vld [vmem:[#allocation2 + $0x70] sm:$0xff]  ;;  %v2736_v49 = vpack.c.bf16 %v597_v28, %v3622_v27 }
  0xfc   : > { %2603 = vmatpush3.bf16.msra.mxu0 %v3542_v51  ;;  %637 = vxpose.xlu0.b32.cont [4/16] %v3575_v6, 128  ;;  %v989_v33 = vld [vmem:[#allocation12 + $0x8] sm:$0xff]  ;;  %v990_v35 = vld [vmem:[#allocation12 + $0x10] sm:$0xff]  ;;  %v991_v37 = vld [vmem:[#allocation12 + $0x18] sm:$0xff]  ;;  %v2740_v52 = vpack.c.bf16 %v599_v30, %v598_v29 }
  0xfd   : > { %2605 = vmatprep.subr.bf16.mxu0 %v3555_v58  ;;  %v992_v39 = vld [vmem:[#allocation12 + $0x20] sm:$0xff]  ;;  %v994_v42 = vld [vmem:[#allocation12 + $0x30] sm:$0xff]  ;;  %v999_v50 = vld [vmem:[#allocation12 + $0x58] sm:$0xff] }
  0xfe   : > { %2635 = vmatpush3.bf16.msra.mxu1 %v2632_v0  ;;  %v996_v45 = vld [vmem:[#allocation12 + $0x40] sm:$0xff]  ;;  %v998_v48 = vld [vmem:[#allocation12 + $0x50] sm:$0xff]  ;;  %v1001_v53 = vld [vmem:[#allocation12 + $0x68] sm:$0xff] }
  0xff   : > { %2637 = vmatprep.subr.bf16.mxu1 %v2636_v7  ;;  %v1003_v56 = vld [vmem:[#allocation12 + $0x78] sm:$0xff]  ;;  %v1310_v57 = vld [vmem:[#allocation10] sm:$0xff]  ;;  %v1312_v59 = vld [vmem:[#allocation10 + $0x10] sm:$0xff] }
 0x100   : > { %2607 = vmatpush3.bf16.msra.mxu0 %v3555_v58  ;;  %638 = vxpose.xlu0.b32.cont [5/16] %v3584_v13, 128  ;;  %v1313_v60 = vld [vmem:[#allocation10 + $0x18] sm:$0xff]  ;;  %v1319_v2 = vld [vmem:[#allocation10 + $0x48] sm:$0xff]  ;;  %v1320_v3 = vld [vmem:[#allocation10 + $0x50] sm:$0xff] }
 0x101   : > { %2609 = vmatprep.subr.bf16.mxu0 %v3568_v1  ;;  %v1317_v0 = vld [vmem:[#allocation10 + $0x38] sm:$0xff] }
 0x102   : > { %2639 = vmatpush3.bf16.msra.mxu1 %v2636_v7  ;;  %v1324_v7 = vld [vmem:[#allocation10 + $0x70] sm:$0xff] }
 0x103   : > { %2641 = vmatprep.subr.bf16.mxu1 %v2640_v14 }
 0x104   : > { %2611 = vmatpush3.bf16.msra.mxu0 %v3568_v1  ;;  %639 = vxpose.xlu0.b32.cont [6/16] %v3591_v18, 128 }
 0x105   : > { %2613 = vmatprep.subr.bf16.mxu0 %v3581_v8 }
 0x106   : > { %2643 = vmatpush3.bf16.msra.mxu1 %v2640_v14 }
 0x107   : > { %2645 = vmatprep.subr.bf16.mxu1 %v2644_v19 }
 0x108   : > { %2615 = vmatpush3.bf16.msra.mxu0 %v3581_v8  ;;  %640 = vxpose.xlu0.b32.cont [7/16] %v3596_v22, 128 }
 0x109   : > { %2617 = vmatprep.subr.bf16.mxu0 %v3588_v15 }
 0x10a   : > { %2647 = vmatpush3.bf16.msra.mxu1 %v2644_v19 }
 0x10b   : > { %2649 = vmatprep.subr.bf16.mxu1 %v2648_v23 }
 0x10c   : > { %2619 = vmatpush3.bf16.msra.mxu0 %v3588_v15  ;;  %641 = vxpose.xlu0.b32.cont [8/16] %v3601_v24, 128  ;;  %v1149_v24 = vld [vmem:[#allocation7] sm:$0xff] }
 0x10d   : > { %2653 = vmatprep.subr.bf16.mxu0 %v3520_v36 }
 0x10e   : > { %2651 = vmatpush3.bf16.msra.mxu1 %v2648_v23 }
 0x10f   : > { %2285 = vmatmul.mubr.f32.vlgmr.msra.gmra.mrb[0].mxu0 %v3529_v44  ;;  %v995_v44 = vld [vmem:[#allocation12 + $0x38] sm:$0xff] }
 0x110   : > { %2655 = vmatpush3.bf16.msra.mxu0 %v3520_v36  ;;  %2287 = vmatprep.mubr.f32.mxu0 %v3531_v46  ;;  %v2720_v36 = vpack.c.bf16 %v3575_v6, %v3562_v63  ;;  %v2732_v46 = vpack.c.bf16 %v3615_v26, %v3608_v25  ;;  %v1316_v63 = vld [vmem:[#allocation10 + $0x30] sm:$0xff]  ;;  %v1323_v6 = vld [vmem:[#allocation10 + $0x68] sm:$0xff] }
 0x111   : > { %2657 = vmatprep.subr.bf16.mxu0 %v3522_v38  ;;  %642 = vxpose.xlu0.b32.cont [9/16] %v3608_v25, 128 }
 0x113   : > { %2288 = vmatmul.mubr.f32.gmra.mrb[2].mxu0 %v3533_v47  ;;  %v997_v47 = vld [vmem:[#allocation12 + $0x48] sm:$0xff] }
 0x114   : > { %2659 = vmatpush3.bf16.msra.mxu0 %v3522_v38  ;;  %2290 = vmatprep.mubr.f32.mxu0 %v3545_v54  ;;  %v601_v38 = vld [vmem:[#allocation2 + $0x78] sm:$0xff]  ;;  %v1002_v54 = vld [vmem:[#allocation12 + $0x70] sm:$0xff] }
 0x115   : > { %2661 = vmatprep.subr.bf16.mxu0 %v3527_v41  ;;  %643 = vxpose.xlu0.b32.cont [10/16] %v3615_v26, 128  ;;  %v1633_v26 = vld [vmem:[#allocation16 + $0x8] sm:$0xff] }
 0x117   : > { %2291 = vmatmul.mubr.f32.gmra.mrb[4].mxu0 %v3547_v55  ;;  %v2744_v55 = vpack.c.bf16 %v601_v38, %v600_v34 }
 0x118   : > { %2663 = vmatpush3.bf16.msra.mxu0 %v3527_v41  ;;  %2293 = vmatprep.mubr.f32.mxu0 %v3558_v61  ;;  %v993_v41 = vld [vmem:[#allocation12 + $0x28] sm:$0xff]  ;;  %v1314_v61 = vld [vmem:[#allocation10 + $0x20] sm:$0xff] }
 0x119   : > { %2665 = vmatprep.subr.bf16.mxu0 %v3542_v51  ;;  %644 = vxpose.xlu0.b32.cont [11/16] %v3622_v27, 128  ;;  %v1632_v27 = vld [vmem:[#allocation16] sm:$0xff] }
 0x11b   : > { %2294 = vmatmul.mubr.f32.gmra.mrb[6].mxu0 %v3560_v62  ;;  %v1315_v62 = vld [vmem:[#allocation10 + $0x28] sm:$0xff] }
 0x11c   : > { %2667 = vmatpush3.bf16.msra.mxu0 %v3542_v51  ;;  %2296 = vmatprep.mubr.f32.mxu0 %v3571_v4  ;;  %v1000_v51 = vld [vmem:[#allocation12 + $0x60] sm:$0xff]  ;;  %v1321_v4 = vld [vmem:[#allocation10 + $0x58] sm:$0xff] }
 0x11d   : > { %2669 = vmatprep.subr.bf16.mxu0 %v3555_v58  ;;  %645 = vxpose.xlu0.b32.cont [12/16] %v597_v28, 128 }
 0x11f   : > { %2297 = vmatmul.mubr.f32.gmra.mrb[8].mxu0 %v3573_v5  ;;  %v1322_v5 = vld [vmem:[#allocation10 + $0x60] sm:$0xff] }
 0x120   : > { %2671 = vmatpush3.bf16.msra.mxu0 %v3555_v58  ;;  %2299 = vmatprep.mubr.f32.mxu0 %v628_v11  ;;  %v1311_v58 = vld [vmem:[#allocation10 + $0x8] sm:$0xff] }
 0x121   : > { %2673 = vmatprep.subr.bf16.mxu0 %v3568_v1  ;;  %646 = vxpose.xlu0.b32.cont [13/16] %v598_v29, 128 }
 0x123   : > { %2300 = vmatmul.mubr.f32.gmra.mrb[10].mxu0 %v629_v12 }
 0x124   : > { %2675 = vmatpush3.bf16.msra.mxu0 %v3568_v1  ;;  %2302 = vmatprep.mubr.f32.mxu0 %v630_v16  ;;  %v1318_v1 = vld [vmem:[#allocation10 + $0x40] sm:$0xff] }
 0x125   : > { %2677 = vmatprep.subr.bf16.mxu0 %v3581_v8  ;;  %647 = vxpose.xlu0.b32.cont [14/16] %v599_v30, 128 }
 0x127   : > { %2303 = vmatmul.mubr.f32.gmra.mrb[12].mxu0 %v631_v17 }
 0x128   : > { %2679 = vmatpush3.bf16.msra.mxu0 %v3581_v8  ;;  %2305 = vmatprep.mubr.f32.mxu0 %v632_v20  ;;  %v1325_v8 = vld [vmem:[#allocation10 + $0x78] sm:$0xff] }
 0x129   : > { %2681 = vmatprep.subr.bf16.mxu0 %v3588_v15  ;;  %648 = vxpose.xlu0.b32.cont [15/16] %v600_v34, 128 }
 0x12b   : > { %2306 = vmatmul.mubr.f32.gmra.mrb[14].mxu0 %v633_v21 }
 0x12c   : > { %2683 = vmatpush3.bf16.msra.mxu0 %v3588_v15  ;;  %2396 = vmatprep.mubr.f32.mxu0 %v988_v31 }
 0x12d   : > { %2717 = vmatprep.subr.bf16.mxu0 %v2716_v32  ;;  %649 = vxpose.xlu0.b32.end [16/16] %v601_v38, 128  ;;  %v1637_v38 = vld [vmem:[#allocation16 + $0x28] sm:$0xff] }
 0x12f   : > { %2397 = vmatmul.mubr.f32.vlgmr.msra.gmra.mrb[16].mxu0 %v989_v33  ;;  %v1634_v33 = vld [vmem:[#allocation16 + $0x10] sm:$0xff] }
 0x130   : > { %2719 = vmatpush3.bf16.msra.mxu0 %v2716_v32  ;;  %2399 = vmatprep.mubr.f32.mxu0 %v990_v35  ;;  %v1635_v32 = vld [vmem:[#allocation16 + $0x18] sm:$0xff] }
 0x131   : > { %2721 = vmatprep.subr.bf16.mxu0 %v2720_v36 }
 0x133   : > { %2400 = vmatmul.mubr.f32.gmra.mrb[18].mxu0 %v991_v37 }
 0x134   : > { %2723 = vmatpush3.bf16.msra.mxu0 %v2720_v36  ;;  %2402 = vmatprep.mubr.f32.mxu0 %v992_v39  ;;  %v1636_v39 = vld [vmem:[#allocation16 + $0x20] sm:$0xff] }
 0x135   : > { %2725 = vmatprep.subr.bf16.mxu0 %v2724_v40 }
 0x137   : > { %2403 = vmatmul.mubr.f32.gmra.mrb[20].mxu0 %v993_v41 }
 0x138   : > { %2727 = vmatpush3.bf16.msra.mxu0 %v2724_v40  ;;  %2405 = vmatprep.mubr.f32.mxu0 %v994_v42 }
 0x139   : > { %2729 = vmatprep.subr.bf16.mxu0 %v2728_v43 }
 0x13b   : > { %2406 = vmatmul.mubr.f32.gmra.mrb[22].mxu0 %v995_v44  ;;  %v1639_v44 = vld [vmem:[#allocation16 + $0x38] sm:$0xff] }
 0x13c   : > { %2731 = vmatpush3.bf16.msra.mxu0 %v2728_v43  ;;  %2408 = vmatprep.mubr.f32.mxu0 %v996_v45  ;;  %v1638_v45 = vld [vmem:[#allocation16 + $0x30] sm:$0xff] }
 0x13d   : > { %2733 = vmatprep.subr.bf16.mxu0 %v2732_v46 }
 0x13f   : > { %2409 = vmatmul.mubr.f32.gmra.mrb[24].mxu0 %v997_v47 }
 0x140   : > { %2735 = vmatpush3.bf16.msra.mxu0 %v2732_v46  ;;  %2411 = vmatprep.mubr.f32.mxu0 %v998_v48 }
 0x141   : > { %2737 = vmatprep.subr.bf16.mxu0 %v2736_v49 }
 0x143   : > { %2412 = vmatmul.mubr.f32.gmra.mrb[26].mxu0 %v999_v50  ;;  %v1641_v50 = vld [vmem:[#allocation16 + $0x48] sm:$0xff] }
 0x144   : > { %2739 = vmatpush3.bf16.msra.mxu0 %v2736_v49  ;;  %2414 = vmatprep.mubr.f32.mxu0 %v1000_v51  ;;  %v1640_v51 = vld [vmem:[#allocation16 + $0x40] sm:$0xff] }
 0x145   : > { %2741 = vmatprep.subr.bf16.mxu0 %v2740_v52 }
 0x147   : > { %2415 = vmatmul.mubr.f32.gmra.mrb[28].mxu0 %v1001_v53 }
 0x148   : > { %2743 = vmatpush3.bf16.msra.mxu0 %v2740_v52  ;;  %2417 = vmatprep.mubr.f32.mxu0 %v1002_v54 }
 0x149   : > { %2745 = vmatprep.subr.bf16.mxu0 %v2744_v55 }
 0x14b   : > { %2418 = vmatmul.mubr.f32.gmra.mrb[30].mxu0 %v1003_v56  ;;  %v1643_v56 = vld [vmem:[#allocation16 + $0x58] sm:$0xff] }
 0x14c   : > { %2747 = vmatpush3.bf16.msra.mxu0 %v2744_v55  ;;  %2508 = vmatprep.mubr.f32.mxu0 %v1310_v57  ;;  %v1642_v57 = vld [vmem:[#allocation16 + $0x50] sm:$0xff] }
 0x14f   : > { %2509 = vmatmul.mubr.f32.vlgmr.msra.gmra.mrb[32].mxu0 %v1311_v58 }
 0x150   : > { %2511 = vmatprep.mubr.f32.mxu0 %v1312_v59 }
 0x153   : > { %2512 = vmatmul.mubr.f32.gmra.mrb[34].mxu0 %v1313_v60 }
 0x154   : > { %2514 = vmatprep.mubr.f32.mxu0 %v1314_v61 }
 0x157   : > { %2515 = vmatmul.mubr.f32.gmra.mrb[36].mxu0 %v1315_v62  ;;  %v1645_v62 = vld [vmem:[#allocation16 + $0x68] sm:$0xff] }
 0x158   : > { %2517 = vmatprep.mubr.f32.mxu0 %v1316_v63  ;;  %v1644_v63 = vld [vmem:[#allocation16 + $0x60] sm:$0xff] }
 0x15b   : > { %2518 = vmatmul.mubr.f32.gmra.mrb[38].mxu0 %v1317_v0 }
 0x15c   : > { %2520 = vmatprep.mubr.f32.mxu0 %v1318_v1 }
 0x15f   : > { %2521 = vmatmul.mubr.f32.gmra.mrb[40].mxu0 %v1319_v2 }
 0x160   : > { %2523 = vmatprep.mubr.f32.mxu0 %v1320_v3 }
 0x163   : > { %2524 = vmatmul.mubr.f32.gmra.mrb[42].mxu0 %v1321_v4  ;;  %v1647_v4 = vld [vmem:[#allocation16 + $0x78] sm:$0xff] }
 0x164   : > { %2526 = vmatprep.mubr.f32.mxu0 %v1322_v5  ;;  %v1646_v5 = vld [vmem:[#allocation16 + $0x70] sm:$0xff] }
 0x167   : > { %2527 = vmatmul.mubr.f32.gmra.mrb[44].mxu0 %v1323_v6 }
 0x168   : > { %2529 = vmatprep.mubr.f32.mxu0 %v1324_v7 }
 0x16b   : > { %2530 = vmatmul.mubr.f32.gmra.mrb[46].mxu0 %v1325_v8 }
 0x171   : > { %v650_v9 = vpop.trf.xlu0 }
 0x172   : > { %2340 = vmatprep.mubr.f32.mxu1 %v650_v9 }
 0x175   : > { %v651_v10 = vpop.trf.xlu0 }
 0x176   : > { %2341 = vmatmul.mubr.f32.vlgmr.msra.gmra.mrb[0].mxu1 %v651_v10 }
 0x179   : > { %v652_v11 = vpop.trf.xlu0 }
 0x17a   : > { %2343 = vmatprep.mubr.f32.mxu1 %v652_v11 }
 0x17d   : > { %v653_v12 = vpop.trf.xlu0 }
 0x17e   : > { %2344 = vmatmul.mubr.f32.gmra.mrb[2].mxu1 %v653_v12 }
 0x181   : > { %v654_v13 = vpop.trf.xlu0 }
 0x182   : > { %2346 = vmatprep.mubr.f32.mxu1 %v654_v13 }
 0x185   : > { %v655_v14 = vpop.trf.xlu0 }
 0x186   : > { %2347 = vmatmul.mubr.f32.gmra.mrb[4].mxu1 %v655_v14 }
 0x189   : > { %v656_v15 = vpop.trf.xlu0 }
 0x18a   : > { %2349 = vmatprep.mubr.f32.mxu1 %v656_v15 }
 0x18d   : > { %v657_v16 = vpop.trf.xlu0 }
 0x18e   : > { %2350 = vmatmul.mubr.f32.gmra.mrb[6].mxu1 %v657_v16 }
 0x191   : > { %v658_v17 = vpop.trf.xlu0 }
 0x192   : > { %2352 = vmatprep.mubr.f32.mxu1 %v658_v17 }
 0x195   : > { %v659_v18 = vpop.trf.xlu0 }
 0x196   : > { %2353 = vmatmul.mubr.f32.gmra.mrb[8].mxu1 %v659_v18 }
 0x199   : > { %v660_v19 = vpop.trf.xlu0 }
 0x19a   : > { %2355 = vmatprep.mubr.f32.mxu1 %v660_v19 }
 0x19d   : > { %v661_v20 = vpop.trf.xlu0 }
 0x19e   : > { %2356 = vmatmul.mubr.f32.gmra.mrb[10].mxu1 %v661_v20 }
 0x1a1   : > { %v662_v21 = vpop.trf.xlu0 }
 0x1a2   : > { %2358 = vmatprep.mubr.f32.mxu1 %v662_v21 }
 0x1a5   : > { %v663_v22 = vpop.trf.xlu0 }
 0x1a6   : > { %2359 = vmatmul.mubr.f32.gmra.mrb[12].mxu1 %v663_v22 }
 0x1a9   : > { %v664_v23 = vpop.trf.xlu0 }
 0x1aa   : > { %2361 = vmatprep.mubr.f32.mxu1 %v664_v23 }
 0x1ad   : > { %v665_v25 = vpop.trf.xlu0 }
 0x1ae   : > { %2362 = vmatmul.mubr.f32.gmra.mrb[14].mxu1 %v665_v25 }
 0x1af   : > { %2452 = vmatprep.mubr.f32.mxu1 %v1149_v24 }
 0x1e2   : > { %v2286_v28 = vpop.f32.mrb[0].mxu0 }
 0x1e3   : > { %v1649_v29 = vadd.f32 %v2286_v28, %v1633_v26  ;;  %1825 = vst [vmem:[#allocation2 + $0x8] sm:$0xff] %v2286_v28  ;;  %v732_v30 = vpop.f32.mrb[1].mxu0 }
 0x1e4   : > { %v1648_v31 = vadd.f32 %v1632_v27, %v732_v30  ;;  %1824 = vst [vmem:[#allocation2] sm:$0xff] %v732_v30 }
 0x1e5   : > { %1665 = vst [vmem:[#allocation16 + $0x8] sm:$0xff] %v1649_v29 }
 0x1e6   : > { %1664 = vst [vmem:[#allocation16] sm:$0xff] %v1648_v31  ;;  %v2289_v34 = vpop.f32.mrb[2].mxu0 }
 0x1e7   : > { %v1651_v35 = vadd.f32 %v2289_v34, %v1635_v32  ;;  %1827 = vst [vmem:[#allocation2 + $0x18] sm:$0xff] %v2289_v34  ;;  %v742_v36 = vpop.f32.mrb[3].mxu0 }
 0x1e8   : > { %v1650_v37 = vadd.f32 %v1634_v33, %v742_v36  ;;  %1826 = vst [vmem:[#allocation2 + $0x10] sm:$0xff] %v742_v36  ;;  %v1150_v36 = vld [vmem:[#allocation7 + $0x8] sm:$0xff] }
 0x1e9   : > { %1667 = vst [vmem:[#allocation16 + $0x18] sm:$0xff] %v1651_v35 }
 0x1ea   : > { %1666 = vst [vmem:[#allocation16 + $0x10] sm:$0xff] %v1650_v37  ;;  %v2292_v40 = vpop.f32.mrb[4].mxu0 }
 0x1eb   : > { %v1653_v41 = vadd.f32 %v2292_v40, %v1637_v38  ;;  %1829 = vst [vmem:[#allocation2 + $0x28] sm:$0xff] %v2292_v40  ;;  %v752_v42 = vpop.f32.mrb[5].mxu0  ;;  %v1151_v38 = vld [vmem:[#allocation7 + $0x10] sm:$0xff] }
 0x1ec   : > { %v1652_v43 = vadd.f32 %v1636_v39, %v752_v42  ;;  %1828 = vst [vmem:[#allocation2 + $0x20] sm:$0xff] %v752_v42 }
 0x1ed   : > { %1669 = vst [vmem:[#allocation16 + $0x28] sm:$0xff] %v1653_v41  ;;  %v1152_v41 = vld [vmem:[#allocation7 + $0x18] sm:$0xff] }
 0x1ee   : > { %1668 = vst [vmem:[#allocation16 + $0x20] sm:$0xff] %v1652_v43  ;;  %v2295_v46 = vpop.f32.mrb[6].mxu0  ;;  %v1153_v43 = vld [vmem:[#allocation7 + $0x20] sm:$0xff] }
 0x1ef   : > { %v1655_v47 = vadd.f32 %v2295_v46, %v1639_v44  ;;  %1831 = vst [vmem:[#allocation2 + $0x38] sm:$0xff] %v2295_v46  ;;  %v762_v48 = vpop.f32.mrb[7].mxu0  ;;  %v1154_v46 = vld [vmem:[#allocation7 + $0x28] sm:$0xff] }
 0x1f0   : > { %v1654_v49 = vadd.f32 %v1638_v45, %v762_v48  ;;  %1830 = vst [vmem:[#allocation2 + $0x30] sm:$0xff] %v762_v48  ;;  %v1155_v48 = vld [vmem:[#allocation7 + $0x30] sm:$0xff] }
 0x1f1   : > { %1671 = vst [vmem:[#allocation16 + $0x38] sm:$0xff] %v1655_v47 }
 0x1f2   : > { %1670 = vst [vmem:[#allocation16 + $0x30] sm:$0xff] %v1654_v49  ;;  %v2298_v52 = vpop.f32.mrb[8].mxu0 }
 0x1f3   : > { %v1657_v53 = vadd.f32 %v2298_v52, %v1641_v50  ;;  %1833 = vst [vmem:[#allocation2 + $0x48] sm:$0xff] %v2298_v52  ;;  %v772_v54 = vpop.f32.mrb[9].mxu0 }
 0x1f4   : > { %v1656_v55 = vadd.f32 %v1640_v51, %v772_v54  ;;  %1832 = vst [vmem:[#allocation2 + $0x40] sm:$0xff] %v772_v54  ;;  %v1156_v51 = vld [vmem:[#allocation7 + $0x38] sm:$0xff] }
 0x1f5   : > { %1673 = vst [vmem:[#allocation16 + $0x48] sm:$0xff] %v1657_v53  ;;  %v1157_v53 = vld [vmem:[#allocation7 + $0x40] sm:$0xff] }
 0x1f6   : > { %1672 = vst [vmem:[#allocation16 + $0x40] sm:$0xff] %v1656_v55  ;;  %v2301_v58 = vpop.f32.mrb[10].mxu0 }
 0x1f7   : > { %v1659_v59 = vadd.f32 %v2301_v58, %v1643_v56  ;;  %1835 = vst [vmem:[#allocation2 + $0x58] sm:$0xff] %v2301_v58  ;;  %v782_v60 = vpop.f32.mrb[11].mxu0  ;;  %v1158_v56 = vld [vmem:[#allocation7 + $0x48] sm:$0xff]  ;;  %v1159_v58 = vld [vmem:[#allocation7 + $0x50] sm:$0xff] }
 0x1f8   : > { %v1658_v61 = vadd.f32 %v1642_v57, %v782_v60  ;;  %1834 = vst [vmem:[#allocation2 + $0x50] sm:$0xff] %v782_v60 }
 0x1f9   : > { %1675 = vst [vmem:[#allocation16 + $0x58] sm:$0xff] %v1659_v59 }
 0x1fa   : > { %1674 = vst [vmem:[#allocation16 + $0x50] sm:$0xff] %v1658_v61  ;;  %v2304_v0 = vpop.f32.mrb[12].mxu0  ;;  %v1160_v61 = vld [vmem:[#allocation7 + $0x58] sm:$0xff] }
 0x1fb   : > { %v1661_v1 = vadd.f32 %v2304_v0, %v1645_v62  ;;  %1837 = vst [vmem:[#allocation2 + $0x68] sm:$0xff] %v2304_v0  ;;  %v792_v2 = vpop.f32.mrb[13].mxu0 }
 0x1fc   : > { %v1660_v3 = vadd.f32 %v1644_v63, %v792_v2  ;;  %1836 = vst [vmem:[#allocation2 + $0x60] sm:$0xff] %v792_v2  ;;  %v1161_v63 = vld [vmem:[#allocation7 + $0x60] sm:$0xff]  ;;  %v1162_v2 = vld [vmem:[#allocation7 + $0x68] sm:$0xff] }
 0x1fd   : > { %1677 = vst [vmem:[#allocation16 + $0x68] sm:$0xff] %v1661_v1 }
 0x1fe   : > { %1676 = vst [vmem:[#allocation16 + $0x60] sm:$0xff] %v1660_v3  ;;  %v2307_v6 = vpop.f32.mrb[14].mxu0 }
 0x1ff   : > { %v1663_v7 = vadd.f32 %v2307_v6, %v1647_v4  ;;  %1839 = vst [vmem:[#allocation2 + $0x78] sm:$0xff] %v2307_v6  ;;  %v802_v8 = vpop.f32.mrb[15].mxu0  ;;  %v1163_v4 = vld [vmem:[#allocation7 + $0x70] sm:$0xff] }
 0x200   : > { %v1662_v9 = vadd.f32 %v1646_v5, %v802_v8  ;;  %1838 = vst [vmem:[#allocation2 + $0x70] sm:$0xff] %v802_v8 }
 0x201   : > { %1679 = vst [vmem:[#allocation16 + $0x78] sm:$0xff] %v1663_v7  ;;  %v1164_v7 = vld [vmem:[#allocation7 + $0x78] sm:$0xff] }
 0x202   : > { %1678 = vst [vmem:[#allocation16 + $0x70] sm:$0xff] %v1662_v9  ;;  %v2398_v10 = vpop.f32.mrb[16].mxu0  ;;  %v1471_v9 = vld [vmem:[#allocation9] sm:$0xff] }
 0x203   : > { %v1070_v11 = vpop.f32.mrb[17].mxu0 }
 0x204   : > { %v2684_v12 = vpack.c.bf16 %v2398_v10, %v1070_v11  ;;  %v1472_v10 = vld [vmem:[#allocation9 + $0x8] sm:$0xff]  ;;  %v1473_v11 = vld [vmem:[#allocation9 + $0x10] sm:$0xff] }
 0x206   : > { %v2401_v13 = vpop.f32.mrb[18].mxu0  ;;  %2685 = vmatprep.subr.bf16.mxu1 %v2684_v12 }
 0x207   : > { %v1080_v14 = vpop.f32.mrb[19].mxu0  ;;  %2687 = vmatpush3.bf16.msra.mxu1 %v2684_v12  ;;  %v1474_v12 = vld [vmem:[#allocation9 + $0x18] sm:$0xff] }
 0x208   : > { %v2688_v15 = vpack.c.bf16 %v2401_v13, %v1080_v14  ;;  %v1475_v13 = vld [vmem:[#allocation9 + $0x20] sm:$0xff]  ;;  %v1476_v14 = vld [vmem:[#allocation9 + $0x28] sm:$0xff] }
 0x20a   : > { %v2404_v16 = vpop.f32.mrb[20].mxu0  ;;  %2689 = vmatprep.subr.bf16.mxu1 %v2688_v15 }
 0x20b   : > { %v1090_v17 = vpop.f32.mrb[21].mxu0  ;;  %2691 = vmatpush3.bf16.msra.mxu1 %v2688_v15  ;;  %v1477_v15 = vld [vmem:[#allocation9 + $0x30] sm:$0xff] }
 0x20c   : > { %v2692_v18 = vpack.c.bf16 %v2404_v16, %v1090_v17 }
 0x20e   : > { %v2407_v19 = vpop.f32.mrb[22].mxu0  ;;  %2693 = vmatprep.subr.bf16.mxu1 %v2692_v18 }
 0x20f   : > { %v1100_v20 = vpop.f32.mrb[23].mxu0  ;;  %2695 = vmatpush3.bf16.msra.mxu1 %v2692_v18  ;;  %v1478_v18 = vld [vmem:[#allocation9 + $0x38] sm:$0xff] }
 0x210   : > { %v2696_v21 = vpack.c.bf16 %v2407_v19, %v1100_v20  ;;  %v1479_v19 = vld [vmem:[#allocation9 + $0x40] sm:$0xff]  ;;  %v1480_v20 = vld [vmem:[#allocation9 + $0x48] sm:$0xff] }
 0x212   : > { %v2410_v22 = vpop.f32.mrb[24].mxu0  ;;  %2697 = vmatprep.subr.bf16.mxu1 %v2696_v21 }
 0x213   : > { %v1110_v23 = vpop.f32.mrb[25].mxu0  ;;  %2699 = vmatpush3.bf16.msra.mxu1 %v2696_v21  ;;  %v1481_v21 = vld [vmem:[#allocation9 + $0x50] sm:$0xff] }
 0x214   : > { %v2700_v24 = vpack.c.bf16 %v2410_v22, %v1110_v23 }
 0x216   : > { %v2413_v25 = vpop.f32.mrb[26].mxu0  ;;  %2701 = vmatprep.subr.bf16.mxu1 %v2700_v24 }
 0x217   : > { %v1120_v26 = vpop.f32.mrb[27].mxu0  ;;  %2703 = vmatpush3.bf16.msra.mxu1 %v2700_v24  ;;  %v1482_v24 = vld [vmem:[#allocation9 + $0x58] sm:$0xff] }
 0x218   : > { %v2704_v27 = vpack.c.bf16 %v2413_v25, %v1120_v26  ;;  %v1483_v25 = vld [vmem:[#allocation9 + $0x60] sm:$0xff]  ;;  %v1484_v26 = vld [vmem:[#allocation9 + $0x68] sm:$0xff] }
 0x21a   : > { %v2416_v28 = vpop.f32.mrb[28].mxu0  ;;  %2705 = vmatprep.subr.bf16.mxu1 %v2704_v27 }
 0x21b   : > { %v1130_v29 = vpop.f32.mrb[29].mxu0  ;;  %2707 = vmatpush3.bf16.msra.mxu1 %v2704_v27  ;;  %v1485_v27 = vld [vmem:[#allocation9 + $0x70] sm:$0xff] }
 0x21c   : > { %v2708_v30 = vpack.c.bf16 %v2416_v28, %v1130_v29 }
 0x21e   : > { %v2419_v31 = vpop.f32.mrb[30].mxu0  ;;  %2709 = vmatprep.subr.bf16.mxu1 %v2708_v30 }
 0x21f   : > { %v1140_v32 = vpop.f32.mrb[31].mxu0  ;;  %2711 = vmatpush3.bf16.msra.mxu1 %v2708_v30  ;;  %v1486_v30 = vld [vmem:[#allocation9 + $0x78] sm:$0xff] }
 0x220   : > { %v2712_v33 = vpack.c.bf16 %v2419_v31, %v1140_v32 }
 0x222   : > { %2713 = vmatprep.subr.bf16.mxu1 %v2712_v33  ;;  %v2510_v34 = vpop.f32.mrb[32].mxu0 }
 0x223   : > { %2715 = vmatpush3.bf16.msra.mxu1 %v2712_v33  ;;  %v1392_v35 = vpop.f32.mrb[33].mxu0 }
 0x224   : > { %v2748_v37 = vpack.c.bf16 %v2510_v34, %v1392_v35 }
 0x226   : > { %2453 = vmatmul.mubr.f32.vlgmr.msra.gmra.mrb[16].mxu1 %v1150_v36  ;;  %v2513_v39 = vpop.f32.mrb[34].mxu0  ;;  %2749 = vmatprep.subr.bf16.mxu1 %v2748_v37 }
 0x227   : > { %v1402_v40 = vpop.f32.mrb[35].mxu0  ;;  %2751 = vmatpush3.bf16.msra.mxu1 %v2748_v37  ;;  %2455 = vmatprep.mubr.f32.mxu1 %v1151_v38 }
 0x228   : > { %v2752_v42 = vpack.c.bf16 %v2513_v39, %v1402_v40 }
 0x22a   : > { %2456 = vmatmul.mubr.f32.gmra.mrb[18].mxu1 %v1152_v41  ;;  %v2516_v44 = vpop.f32.mrb[36].mxu0  ;;  %2753 = vmatprep.subr.bf16.mxu1 %v2752_v42 }
 0x22b   : > { %v1412_v45 = vpop.f32.mrb[37].mxu0  ;;  %2755 = vmatpush3.bf16.msra.mxu1 %v2752_v42  ;;  %2458 = vmatprep.mubr.f32.mxu1 %v1153_v43 }
 0x22c   : > { %v2756_v47 = vpack.c.bf16 %v2516_v44, %v1412_v45 }
 0x22e   : > { %2459 = vmatmul.mubr.f32.gmra.mrb[20].mxu1 %v1154_v46  ;;  %v2519_v49 = vpop.f32.mrb[38].mxu0  ;;  %2757 = vmatprep.subr.bf16.mxu1 %v2756_v47 }
 0x22f   : > { %v1422_v50 = vpop.f32.mrb[39].mxu0  ;;  %2759 = vmatpush3.bf16.msra.mxu1 %v2756_v47  ;;  %2461 = vmatprep.mubr.f32.mxu1 %v1155_v48 }
 0x230   : > { %v2760_v52 = vpack.c.bf16 %v2519_v49, %v1422_v50 }
 0x232   : > { %2462 = vmatmul.mubr.f32.gmra.mrb[22].mxu1 %v1156_v51  ;;  %v2522_v54 = vpop.f32.mrb[40].mxu0  ;;  %2761 = vmatprep.subr.bf16.mxu1 %v2760_v52 }
 0x233   : > { %v1432_v55 = vpop.f32.mrb[41].mxu0  ;;  %2763 = vmatpush3.bf16.msra.mxu1 %v2760_v52  ;;  %2464 = vmatprep.mubr.f32.mxu1 %v1157_v53 }
 0x234   : > { %v2764_v57 = vpack.c.bf16 %v2522_v54, %v1432_v55 }
 0x236   : > { %2465 = vmatmul.mubr.f32.gmra.mrb[24].mxu1 %v1158_v56  ;;  %v2525_v59 = vpop.f32.mrb[42].mxu0  ;;  %2765 = vmatprep.subr.bf16.mxu1 %v2764_v57 }
 0x237   : > { %v1442_v60 = vpop.f32.mrb[43].mxu0  ;;  %2767 = vmatpush3.bf16.msra.mxu1 %v2764_v57  ;;  %2467 = vmatprep.mubr.f32.mxu1 %v1159_v58 }
 0x238   : > { %v2768_v62 = vpack.c.bf16 %v2525_v59, %v1442_v60 }
 0x23a   : > { %2468 = vmatmul.mubr.f32.gmra.mrb[26].mxu1 %v1160_v61  ;;  %v2528_v0 = vpop.f32.mrb[44].mxu0  ;;  %2769 = vmatprep.subr.bf16.mxu1 %v2768_v62 }
 0x23b   : > { %v1452_v1 = vpop.f32.mrb[45].mxu0  ;;  %2771 = vmatpush3.bf16.msra.mxu1 %v2768_v62  ;;  %2470 = vmatprep.mubr.f32.mxu1 %v1161_v63 }
 0x23c   : > { %v2772_v3 = vpack.c.bf16 %v2528_v0, %v1452_v1 }
 0x23e   : > { %2471 = vmatmul.mubr.f32.gmra.mrb[28].mxu1 %v1162_v2  ;;  %v2531_v5 = vpop.f32.mrb[46].mxu0  ;;  %2773 = vmatprep.subr.bf16.mxu1 %v2772_v3 }
 0x23f   : > { %v1462_v6 = vpop.f32.mrb[47].mxu0  ;;  %2775 = vmatpush3.bf16.msra.mxu1 %v2772_v3  ;;  %2473 = vmatprep.mubr.f32.mxu1 %v1163_v4 }
 0x240   : > { %v2776_v8 = vpack.c.bf16 %v2531_v5, %v1462_v6 }
 0x242   : > { %2474 = vmatmul.mubr.f32.gmra.mrb[30].mxu1 %v1164_v7  ;;  %2777 = vmatprep.subr.bf16.mxu1 %v2776_v8 }
 0x243   : > { %2779 = vmatpush3.bf16.msra.mxu1 %v2776_v8  ;;  %2564 = vmatprep.mubr.f32.mxu1 %v1471_v9 }
 0x246   : > { %2565 = vmatmul.mubr.f32.vlgmr.msra.gmra.mrb[32].mxu1 %v1472_v10 }
 0x247   : > { %2567 = vmatprep.mubr.f32.mxu1 %v1473_v11 }
 0x249   : > { %v2342_v16 = vpop.f32.mrb[0].mxu1 }
 0x24a   : > { %2568 = vmatmul.mubr.f32.gmra.mrb[34].mxu1 %v1474_v12  ;;  %v877_v17 = vpop.f32.mrb[1].mxu1 }
 0x24b   : > { %2570 = vmatprep.mubr.f32.mxu1 %v1475_v13  ;;  %956 = vxpose.xlu1.b32.start [1/16] %v877_v17, 128 }
 0x24e   : > { %2571 = vmatmul.mubr.f32.gmra.mrb[36].mxu1 %v1476_v14 }
 0x24f   : > { %2573 = vmatprep.mubr.f32.mxu1 %v1477_v15  ;;  %957 = vxpose.xlu1.b32.cont [2/16] %v2342_v16, 128 }
 0x251   : > { %v2345_v22 = vpop.f32.mrb[2].mxu1 }
 0x252   : > { %2574 = vmatmul.mubr.f32.gmra.mrb[38].mxu1 %v1478_v18  ;;  %v887_v23 = vpop.f32.mrb[3].mxu1 }
 0x253   : > { %2576 = vmatprep.mubr.f32.mxu1 %v1479_v19  ;;  %958 = vxpose.xlu1.b32.cont [3/16] %v887_v23, 128 }
 0x256   : > { %2577 = vmatmul.mubr.f32.gmra.mrb[40].mxu1 %v1480_v20 }
 0x257   : > { %2579 = vmatprep.mubr.f32.mxu1 %v1481_v21  ;;  %959 = vxpose.xlu1.b32.cont [4/16] %v2345_v22, 128 }
 0x259   : > { %v2348_v28 = vpop.f32.mrb[4].mxu1 }
 0x25a   : > { %2580 = vmatmul.mubr.f32.gmra.mrb[42].mxu1 %v1482_v24  ;;  %v897_v29 = vpop.f32.mrb[5].mxu1 }
 0x25b   : > { %2582 = vmatprep.mubr.f32.mxu1 %v1483_v25  ;;  %960 = vxpose.xlu1.b32.cont [5/16] %v897_v29, 128 }
 0x25e   : > { %2583 = vmatmul.mubr.f32.gmra.mrb[44].mxu1 %v1484_v26 }
 0x25f   : > { %2585 = vmatprep.mubr.f32.mxu1 %v1485_v27  ;;  %961 = vxpose.xlu1.b32.cont [6/16] %v2348_v28, 128 }
 0x261   : > { %v2351_v31 = vpop.f32.mrb[6].mxu1 }
 0x262   : > { %2586 = vmatmul.mubr.f32.gmra.mrb[46].mxu1 %v1486_v30  ;;  %v907_v32 = vpop.f32.mrb[7].mxu1 }
 0x263   : > { %962 = vxpose.xlu1.b32.cont [7/16] %v907_v32, 128 }
 0x267   : > { %963 = vxpose.xlu1.b32.cont [8/16] %v2351_v31, 128 }
 0x269   : > { %v2354_v33 = vpop.f32.mrb[8].mxu1 }
 0x26a   : > { %v917_v34 = vpop.f32.mrb[9].mxu1 }
 0x26b   : > { %964 = vxpose.xlu1.b32.cont [9/16] %v917_v34, 128 }
 0x26f   : > { %965 = vxpose.xlu1.b32.cont [10/16] %v2354_v33, 128 }
 0x271   : > { %v2357_v35 = vpop.f32.mrb[10].mxu1 }
 0x272   : > { %v927_v36 = vpop.f32.mrb[11].mxu1 }
 0x273   : > { %966 = vxpose.xlu1.b32.cont [11/16] %v927_v36, 128 }
 0x277   : > { %967 = vxpose.xlu1.b32.cont [12/16] %v2357_v35, 128 }
 0x279   : > { %v2360_v37 = vpop.f32.mrb[12].mxu1 }
 0x27a   : > { %v937_v38 = vpop.f32.mrb[13].mxu1 }
 0x27b   : > { %968 = vxpose.xlu1.b32.cont [13/16] %v937_v38, 128 }
 0x27f   : > { %969 = vxpose.xlu1.b32.cont [14/16] %v2360_v37, 128 }
 0x281   : > { %v2363_v39 = vpop.f32.mrb[14].mxu1 }
 0x282   : > { %v947_v40 = vpop.f32.mrb[15].mxu1 }
 0x283   : > { %970 = vxpose.xlu1.b32.cont [15/16] %v947_v40, 128 }
 0x287   : > { %971 = vxpose.xlu1.b32.end [16/16] %v2363_v39, 128 }
 0x288   : > { %3101 = shalt.err (!%p3098_p13)
}
 0x289   : > { %s3102_s24 = scalar_lea.hbm %s3755_s7, 2048 }
 0x28a   : > { %p3103_p0 = scmp.ne.s32.totalorder %s3755_s7, %s3102_s24  ;;  %p3108_p5 = scmp.lt.u32.totalorder %s3102_s24, %s3755_s7 }
 0x28c   : > { %p3104_p1 = pnand %p3103_p0, %p2860_p2 }
 0x28e   : > { %p3105_p6 = pneg %p3104_p1 }
 0x290   : > { %p3110_p7 = pnand %p3108_p5, %p3105_p6 }
 0x292   : > { %3113 = shalt.err (!%p3110_p7)
}
 0x293   : > { %s3239_s28 = smov 128   ;;  %s3240_s29 = smov 8   ;;  %v1680_v41 = vld [vmem:[#allocation17] sm:$0xff]  ;;  %v1681_v44 = vld [vmem:[#allocation17 + $0x8] sm:$0xff]  ;;  %v1682_v47 = vld [vmem:[#allocation17 + $0x10] sm:$0xff] }
 0x294   : > { %2809 = dma.vmem_to_hbm [thread:$0]  (%p2860_p2), %s1863_s20, 2048, %s3755_s7, [#allocation6], %s3239_s28, %s3239_s28, %s3240_s29   ;;  %v1683_v50 = vld [vmem:[#allocation17 + $0x18] sm:$0xff]  ;;  %v1684_v53 = vld [vmem:[#allocation17 + $0x20] sm:$0xff]  ;;  %v1685_v56 = vld [vmem:[#allocation17 + $0x28] sm:$0xff] }
 0x295   : > { %v1686_v59 = vld [vmem:[#allocation17 + $0x30] sm:$0xff]  ;;  %v1687_v62 = vld [vmem:[#allocation17 + $0x38] sm:$0xff]  ;;  %v1688_v1 = vld [vmem:[#allocation17 + $0x40] sm:$0xff]  ;;  %s3241_s16 = smov [#allocation17]  }
 0x296   : > { %v1689_v4 = vld [vmem:[#allocation17 + $0x48] sm:$0xff]  ;;  %v1690_v7 = vld [vmem:[#allocation17 + $0x50] sm:$0xff]  ;;  %v1728_v10 = vld [vmem:[#allocation19] sm:$0xff]  ;;  %s1875_s26 = sshll.u32 %s3241_s16, 4  ;;  %s1876_s26 = int_to_ptr.vmem [resolvable:$true] %s1875_s26 }
 0x297   : > { %v1729_v8 = vld [vmem:[#allocation19 + $0x8] sm:$0xff]  ;;  %v1691_v13 = vld [vmem:[#allocation17 + $0x58] sm:$0xff]  ;;  %v1730_v19 = vld [vmem:[#allocation19 + $0x10] sm:$0xff]  ;;  %s3114_s22 = scalar_lea.vmem %s1876_s26, 2048  ;;  %p3121_p12 = scmp.lt.s32.totalorder %s1876_s26, %s1876_s26 }
 0x298   : > { %v1731_v17 = vld [vmem:[#allocation19 + $0x18] sm:$0xff]  ;;  %v1692_v22 = vld [vmem:[#allocation17 + $0x60] sm:$0xff]  ;;  %v1733_v26 = vld [vmem:[#allocation19 + $0x28] sm:$0xff]  ;;  %p3115_p9 = scmp.ne.s32.totalorder %s1876_s26, %s3114_s22  ;;  %p3122_p3 = scmp.lt.s32.totalorder %s3114_s22, %s3114_s22 }
 0x299   : > { %v1732_v28 = vld [vmem:[#allocation19 + $0x20] sm:$0xff]  ;;  %v1693_v31 = vld [vmem:[#allocation17 + $0x68] sm:$0xff]  ;;  %v1735_v35 = vld [vmem:[#allocation19 + $0x38] sm:$0xff] }
 0x29a   : > { %v1734_v37 = vld [vmem:[#allocation19 + $0x30] sm:$0xff]  ;;  %p3116_p10 = pnand %p3115_p9, %p2860_p2  ;;  %p3123_p8 = por %p3122_p3, %p3121_p12 }
 0x29b   : > { %v1694_v40 = vld [vmem:[#allocation17 + $0x70] sm:$0xff] }
 0x29c   : > { %p3117_p11 = pneg %p3116_p10 }
 0x29e   : > { %p3124_p4 = pnand %p3123_p8, %p3117_p11 }
 0x2cb   : > { %v972_v42 = vpop.trf.xlu1 }
 0x2cc   : > { %v1696_v43 = vadd.f32 %v1680_v41, %v972_v42  ;;  %1840 = vst [vmem:[#allocation3] sm:$0xff] %v972_v42 }
 0x2ce   : > { %1712 = vst [vmem:[#allocation17] sm:$0xff] %v1696_v43 }
 0x2cf   : > { %v973_v45 = vpop.trf.xlu1 }
 0x2d0   : > { %v1697_v46 = vadd.f32 %v1681_v44, %v973_v45  ;;  %1841 = vst [vmem:[#allocation3 + $0x8] sm:$0xff] %v973_v45  ;;  %v1737_v44 = vld [vmem:[#allocation19 + $0x48] sm:$0xff] }
 0x2d2   : > { %1713 = vst [vmem:[#allocation17 + $0x8] sm:$0xff] %v1697_v46  ;;  %v1736_v46 = vld [vmem:[#allocation19 + $0x40] sm:$0xff] }
 0x2d3   : > { %v974_v48 = vpop.trf.xlu1 }
 0x2d4   : > { %v1698_v49 = vadd.f32 %v1682_v47, %v974_v48  ;;  %1842 = vst [vmem:[#allocation3 + $0x10] sm:$0xff] %v974_v48 }
 0x2d6   : > { %1714 = vst [vmem:[#allocation17 + $0x10] sm:$0xff] %v1698_v49  ;;  %v1695_v49 = vld [vmem:[#allocation17 + $0x78] sm:$0xff] }
 0x2d7   : > { %v975_v51 = vpop.trf.xlu1 }
 0x2d8   : > { %v1699_v52 = vadd.f32 %v1683_v50, %v975_v51  ;;  %1843 = vst [vmem:[#allocation3 + $0x18] sm:$0xff] %v975_v51 }
 0x2da   : > { %1715 = vst [vmem:[#allocation17 + $0x18] sm:$0xff] %v1699_v52 }
 0x2db   : > { %v976_v54 = vpop.trf.xlu1 }
 0x2dc   : > { %v1700_v55 = vadd.f32 %v1684_v53, %v976_v54  ;;  %1844 = vst [vmem:[#allocation3 + $0x20] sm:$0xff] %v976_v54  ;;  %v1739_v53 = vld [vmem:[#allocation19 + $0x58] sm:$0xff] }
 0x2de   : > { %1716 = vst [vmem:[#allocation17 + $0x20] sm:$0xff] %v1700_v55  ;;  %v1738_v55 = vld [vmem:[#allocation19 + $0x50] sm:$0xff] }
 0x2df   : > { %v977_v57 = vpop.trf.xlu1 }
 0x2e0   : > { %v1701_v58 = vadd.f32 %v1685_v56, %v977_v57  ;;  %1845 = vst [vmem:[#allocation3 + $0x28] sm:$0xff] %v977_v57 }
 0x2e2   : > { %1717 = vst [vmem:[#allocation17 + $0x28] sm:$0xff] %v1701_v58 }
 0x2e3   : > { %v978_v60 = vpop.trf.xlu1 }
 0x2e4   : > { %v1702_v61 = vadd.f32 %v1686_v59, %v978_v60  ;;  %1846 = vst [vmem:[#allocation3 + $0x30] sm:$0xff] %v978_v60 }
 0x2e6   : > { %1718 = vst [vmem:[#allocation17 + $0x30] sm:$0xff] %v1702_v61  ;;  %v1741_v61 = vld [vmem:[#allocation19 + $0x68] sm:$0xff] }
 0x2e7   : > { %v979_v63 = vpop.trf.xlu1 }
 0x2e8   : > { %v1703_v0 = vadd.f32 %v1687_v62, %v979_v63  ;;  %1847 = vst [vmem:[#allocation3 + $0x38] sm:$0xff] %v979_v63 }
 0x2ea   : > { %1719 = vst [vmem:[#allocation17 + $0x38] sm:$0xff] %v1703_v0 }
 0x2eb   : > { %v980_v2 = vpop.trf.xlu1 }
 0x2ec   : > { %v1704_v3 = vadd.f32 %v1688_v1, %v980_v2  ;;  %1848 = vst [vmem:[#allocation3 + $0x40] sm:$0xff] %v980_v2 }
 0x2ee   : > { %1720 = vst [vmem:[#allocation17 + $0x40] sm:$0xff] %v1704_v3 }
 0x2ef   : > { %v981_v5 = vpop.trf.xlu1 }
 0x2f0   : > { %v1705_v6 = vadd.f32 %v1689_v4, %v981_v5  ;;  %1849 = vst [vmem:[#allocation3 + $0x48] sm:$0xff] %v981_v5 }
 0x2f2   : > { %1721 = vst [vmem:[#allocation17 + $0x48] sm:$0xff] %v1705_v6 }
 0x2f3   : > { %v982_v9 = vpop.trf.xlu1 }
 0x2f4   : > { %v1706_v11 = vadd.f32 %v1690_v7, %v982_v9  ;;  %1850 = vst [vmem:[#allocation3 + $0x50] sm:$0xff] %v982_v9 }
 0x2f6   : > { %1722 = vst [vmem:[#allocation17 + $0x50] sm:$0xff] %v1706_v11 }
 0x2f7   : > { %v983_v18 = vpop.trf.xlu1 }
 0x2f8   : > { %v1707_v20 = vadd.f32 %v1691_v13, %v983_v18  ;;  %1851 = vst [vmem:[#allocation3 + $0x58] sm:$0xff] %v983_v18 }
 0x2f9   : > { %v2454_v12 = vpop.f32.mrb[16].mxu1 }
 0x2fa   : > { %v1745_v14 = vadd.f32 %v2454_v12, %v1729_v8  ;;  %v1231_v15 = vpop.f32.mrb[17].mxu1  ;;  %1723 = vst [vmem:[#allocation17 + $0x58] sm:$0xff] %v1707_v20 }
 0x2fb   : > { %v1744_v16 = vadd.f32 %v1728_v10, %v1231_v15  ;;  %v984_v27 = vpop.trf.xlu1 }
 0x2fc   : > { %1761 = vst [vmem:[#allocation19 + $0x8] sm:$0xff] %v1745_v14  ;;  %v1708_v29 = vadd.f32 %v1692_v22, %v984_v27  ;;  %1852 = vst [vmem:[#allocation3 + $0x60] sm:$0xff] %v984_v27 }
 0x2fd   : > { %1760 = vst [vmem:[#allocation19] sm:$0xff] %v1744_v16  ;;  %v2457_v21 = vpop.f32.mrb[18].mxu1 }
 0x2fe   : > { %v1747_v23 = vadd.f32 %v2457_v21, %v1731_v17  ;;  %v1241_v24 = vpop.f32.mrb[19].mxu1  ;;  %1724 = vst [vmem:[#allocation17 + $0x60] sm:$0xff] %v1708_v29 }
 0x2ff   : > { %v1746_v25 = vadd.f32 %v1730_v19, %v1241_v24  ;;  %v985_v36 = vpop.trf.xlu1 }
 0x300   : > { %1763 = vst [vmem:[#allocation19 + $0x18] sm:$0xff] %v1747_v23  ;;  %v1709_v38 = vadd.f32 %v1693_v31, %v985_v36  ;;  %1853 = vst [vmem:[#allocation3 + $0x68] sm:$0xff] %v985_v36 }
 0x301   : > { %1762 = vst [vmem:[#allocation19 + $0x10] sm:$0xff] %v1746_v25  ;;  %v2460_v30 = vpop.f32.mrb[20].mxu1 }
 0x302   : > { %v1749_v32 = vadd.f32 %v2460_v30, %v1733_v26  ;;  %v1251_v33 = vpop.f32.mrb[21].mxu1  ;;  %1725 = vst [vmem:[#allocation17 + $0x68] sm:$0xff] %v1709_v38 }
 0x303   : > { %v1748_v34 = vadd.f32 %v1732_v28, %v1251_v33  ;;  %v986_v45 = vpop.trf.xlu1 }
 0x304   : > { %1765 = vst [vmem:[#allocation19 + $0x28] sm:$0xff] %v1749_v32  ;;  %v1710_v47 = vadd.f32 %v1694_v40, %v986_v45  ;;  %1854 = vst [vmem:[#allocation3 + $0x70] sm:$0xff] %v986_v45 }
 0x305   : > { %1764 = vst [vmem:[#allocation19 + $0x20] sm:$0xff] %v1748_v34  ;;  %v2463_v39 = vpop.f32.mrb[22].mxu1 }
 0x306   : > { %v1751_v41 = vadd.f32 %v2463_v39, %v1735_v35  ;;  %v1261_v42 = vpop.f32.mrb[23].mxu1  ;;  %1726 = vst [vmem:[#allocation17 + $0x70] sm:$0xff] %v1710_v47 }
 0x307   : > { %v1750_v43 = vadd.f32 %v1734_v37, %v1261_v42  ;;  %v987_v54 = vpop.trf.xlu1 }
 0x308   : > { %1767 = vst [vmem:[#allocation19 + $0x38] sm:$0xff] %v1751_v41  ;;  %v1711_v56 = vadd.f32 %v1695_v49, %v987_v54  ;;  %1855 = vst [vmem:[#allocation3 + $0x78] sm:$0xff] %v987_v54 }
 0x309   : > { %1766 = vst [vmem:[#allocation19 + $0x30] sm:$0xff] %v1750_v43  ;;  %v2466_v48 = vpop.f32.mrb[24].mxu1 }
 0x30a   : > { %v1753_v50 = vadd.f32 %v2466_v48, %v1737_v44  ;;  %v1271_v51 = vpop.f32.mrb[25].mxu1  ;;  %1727 = vst [vmem:[#allocation17 + $0x78] sm:$0xff] %v1711_v56 }
 0x30b   : > { %v1752_v52 = vadd.f32 %v1736_v46, %v1271_v51 }
 0x30c   : > { %1769 = vst [vmem:[#allocation19 + $0x48] sm:$0xff] %v1753_v50 }
 0x30d   : > { %1768 = vst [vmem:[#allocation19 + $0x40] sm:$0xff] %v1752_v52  ;;  %v2469_v57 = vpop.f32.mrb[26].mxu1 }
 0x30e   : > { %v1755_v58 = vadd.f32 %v2469_v57, %v1739_v53  ;;  %v1281_v59 = vpop.f32.mrb[27].mxu1 }
 0x30f   : > { %v1754_v60 = vadd.f32 %v1738_v55, %v1281_v59 }
 0x310   : > { %3127 = shalt.err (!%p3124_p4)
}
 0x311   : > { %s3128_s20 = scalar_lea.hbm %s3756_s8, 2048 }
 0x312   : > { %p3129_p13 = scmp.ne.s32.totalorder %s3756_s8, %s3128_s20  ;;  %p3134_p6 = scmp.lt.u32.totalorder %s3128_s20, %s3756_s8 }
 0x314   : > { %p3130_p0 = pnand %p3129_p13, %p2860_p2 }
 0x316   : > { %p3131_p1 = pneg %p3130_p0 }
 0x318   : > { %p3136_p5 = pnand %p3134_p6, %p3131_p1 }
 0x31a   : > { %3139 = shalt.err (!%p3136_p5)
}
 0x31b   : > { %2811 = dma.vmem_to_hbm [thread:$0]  (%p2860_p2), %s1876_s26, 2048, %s3756_s8, [#allocation18], %s3239_s28, %s3239_s28, %s3240_s29   ;;  %1771 = vst [vmem:[#allocation19 + $0x58] sm:$0xff] %v1755_v58  ;;  %v1740_v62 = vld [vmem:[#allocation19 + $0x60] sm:$0xff]  ;;  %1770 = vst [vmem:[#allocation19 + $0x50] sm:$0xff] %v1754_v60  ;;  %v2472_v63 = vpop.f32.mrb[28].mxu1 }
 0x31c   : > { %v1757_v0 = vadd.f32 %v2472_v63, %v1741_v61  ;;  %v1291_v1 = vpop.f32.mrb[29].mxu1  ;;  %v1743_v3 = vld [vmem:[#allocation19 + $0x78] sm:$0xff]  ;;  %v1742_v4 = vld [vmem:[#allocation19 + $0x70] sm:$0xff]  ;;  %s3242_s25 = smov [#allocation19]   ;;  %v1777_v9 = vld [vmem:[#allocation20 + $0x8] sm:$0xff] }
 0x31d   : > { %v1756_v2 = vadd.f32 %v1740_v62, %v1291_v1  ;;  %s1888_s27 = sshll.u32 %s3242_s25, 4  ;;  %v2475_v5 = vpop.f32.mrb[30].mxu1  ;;  %v1776_v10 = vld [vmem:[#allocation20] sm:$0xff]  ;;  %s1889_s27 = int_to_ptr.vmem [resolvable:$true] %s1888_s27 }
 0x31e   : > { %1773 = vst [vmem:[#allocation19 + $0x68] sm:$0xff] %v1757_v0  ;;  %v1759_v6 = vadd.f32 %v2475_v5, %v1743_v3  ;;  %v1301_v7 = vpop.f32.mrb[31].mxu1  ;;  %s3140_s11 = scalar_lea.vmem %s1889_s27, 2048  ;;  %p3147_p11 = scmp.lt.s32.totalorder %s1889_s27, %s1889_s27 }
 0x31f   : > { %1772 = vst [vmem:[#allocation19 + $0x60] sm:$0xff] %v1756_v2  ;;  %v1758_v8 = vadd.f32 %v1742_v4, %v1301_v7  ;;  %v2566_v11 = vpop.f32.mrb[32].mxu1  ;;  %p3141_p7 = scmp.ne.s32.totalorder %s1889_s27, %s3140_s11  ;;  %p3148_p12 = scmp.lt.s32.totalorder %s3140_s11, %s3140_s11 }
 0x320   : > { %1775 = vst [vmem:[#allocation19 + $0x78] sm:$0xff] %v1759_v6  ;;  %v1793_v12 = vadd.f32 %v2566_v11, %v1777_v9  ;;  %v1553_v13 = vpop.f32.mrb[33].mxu1 }
 0x321   : > { %1774 = vst [vmem:[#allocation19 + $0x70] sm:$0xff] %v1758_v8  ;;  %p3142_p9 = pnand %p3141_p7, %p2860_p2  ;;  %p3149_p3 = por %p3148_p12, %p3147_p11 }
 0x323   : > { %p3143_p10 = pneg %p3142_p9 }
 0x325   : > { %p3150_p8 = pnand %p3149_p3, %p3143_p10 }
 0x327   : > { %3153 = shalt.err (!%p3150_p8)
}
 0x328   : > { %s3154_s26 = scalar_lea.hbm %s3757_s9, 2048 }
 0x329   : > { %p3155_p4 = scmp.ne.s32.totalorder %s3757_s9, %s3154_s26  ;;  %p3160_p1 = scmp.lt.u32.totalorder %s3154_s26, %s3757_s9 }
 0x32b   : > { %p3156_p13 = pnand %p3155_p4, %p2860_p2 }
 0x32d   : > { %p3157_p0 = pneg %p3156_p13 }
 0x32f   : > { %p3162_p6 = pnand %p3160_p1, %p3157_p0 }
 0x331   : > { %3165 = shalt.err (!%p3162_p6)
}
 0x332   : > { %2813 = dma.vmem_to_hbm [thread:$0]  (%p2860_p2), %s1889_s27, 2048, %s3757_s9, [#allocation18], %s3239_s28, %s3239_s28, %s3240_s29   ;;  %v1792_v14 = vadd.f32 %v1776_v10, %v1553_v13  ;;  %v1779_v15 = vld [vmem:[#allocation20 + $0x18] sm:$0xff]  ;;  %1809 = vst [vmem:[#allocation20 + $0x8] sm:$0xff] %v1793_v12  ;;  %v1778_v16 = vld [vmem:[#allocation20 + $0x10] sm:$0xff]  ;;  %v2569_v17 = vpop.f32.mrb[34].mxu1 }
 0x333   : > { %v1795_v18 = vadd.f32 %v2569_v17, %v1779_v15  ;;  %v1563_v19 = vpop.f32.mrb[35].mxu1  ;;  %v1781_v21 = vld [vmem:[#allocation20 + $0x28] sm:$0xff]  ;;  %v1780_v22 = vld [vmem:[#allocation20 + $0x20] sm:$0xff]  ;;  %v1783_v27 = vld [vmem:[#allocation20 + $0x38] sm:$0xff]  ;;  %s3243_s21 = smov [#allocation20]  }
 0x334   : > { %1808 = vst [vmem:[#allocation20] sm:$0xff] %v1792_v14  ;;  %v1794_v20 = vadd.f32 %v1778_v16, %v1563_v19  ;;  %v2572_v23 = vpop.f32.mrb[36].mxu1  ;;  %v1782_v28 = vld [vmem:[#allocation20 + $0x30] sm:$0xff]  ;;  %v1785_v33 = vld [vmem:[#allocation20 + $0x48] sm:$0xff]  ;;  %v1784_v34 = vld [vmem:[#allocation20 + $0x40] sm:$0xff]  ;;  %s1901_s24 = sshll.u32 %s3243_s21, 4  ;;  %s1902_s24 = int_to_ptr.vmem [resolvable:$true] %s1901_s24 }
 0x335   : > { %1811 = vst [vmem:[#allocation20 + $0x18] sm:$0xff] %v1795_v18  ;;  %v1797_v24 = vadd.f32 %v2572_v23, %v1781_v21  ;;  %v1573_v25 = vpop.f32.mrb[37].mxu1  ;;  %v1787_v39 = vld [vmem:[#allocation20 + $0x58] sm:$0xff]  ;;  %v1786_v40 = vld [vmem:[#allocation20 + $0x50] sm:$0xff]  ;;  %v1789_v45 = vld [vmem:[#allocation20 + $0x68] sm:$0xff]  ;;  %s3166_s19 = scalar_lea.vmem %s1902_s24, 2048  ;;  %p3173_p10 = scmp.lt.s32.totalorder %s1902_s24, %s1902_s24 }
 0x336   : > { %1810 = vst [vmem:[#allocation20 + $0x10] sm:$0xff] %v1794_v20  ;;  %v1796_v26 = vadd.f32 %v1780_v22, %v1573_v25  ;;  %v2575_v29 = vpop.f32.mrb[38].mxu1  ;;  %v1788_v46 = vld [vmem:[#allocation20 + $0x60] sm:$0xff]  ;;  %v1791_v51 = vld [vmem:[#allocation20 + $0x78] sm:$0xff]  ;;  %v1790_v52 = vld [vmem:[#allocation20 + $0x70] sm:$0xff]  ;;  %p3167_p5 = scmp.ne.s32.totalorder %s1902_s24, %s3166_s19  ;;  %p3174_p11 = scmp.lt.s32.totalorder %s3166_s19, %s3166_s19 }
 0x337   : > { %1813 = vst [vmem:[#allocation20 + $0x28] sm:$0xff] %v1797_v24  ;;  %v1799_v30 = vadd.f32 %v2575_v29, %v1783_v27  ;;  %v1583_v31 = vpop.f32.mrb[39].mxu1 }
 0x338   : > { %1812 = vst [vmem:[#allocation20 + $0x20] sm:$0xff] %v1796_v26  ;;  %v1798_v32 = vadd.f32 %v1782_v28, %v1583_v31  ;;  %v2578_v35 = vpop.f32.mrb[40].mxu1  ;;  %p3168_p7 = pnand %p3167_p5, %p2860_p2  ;;  %p3175_p12 = por %p3174_p11, %p3173_p10 }
 0x339   : > { %1815 = vst [vmem:[#allocation20 + $0x38] sm:$0xff] %v1799_v30  ;;  %v1801_v36 = vadd.f32 %v2578_v35, %v1785_v33  ;;  %v1593_v37 = vpop.f32.mrb[41].mxu1 }
 0x33a   : > { %1814 = vst [vmem:[#allocation20 + $0x30] sm:$0xff] %v1798_v32  ;;  %v1800_v38 = vadd.f32 %v1784_v34, %v1593_v37  ;;  %v2581_v41 = vpop.f32.mrb[42].mxu1  ;;  %p3169_p9 = pneg %p3168_p7 }
 0x33b   : > { %1817 = vst [vmem:[#allocation20 + $0x48] sm:$0xff] %v1801_v36  ;;  %v1803_v42 = vadd.f32 %v2581_v41, %v1787_v39  ;;  %v1603_v43 = vpop.f32.mrb[43].mxu1 }
 0x33c   : > { %1816 = vst [vmem:[#allocation20 + $0x40] sm:$0xff] %v1800_v38  ;;  %v1802_v44 = vadd.f32 %v1786_v40, %v1603_v43  ;;  %v2584_v47 = vpop.f32.mrb[44].mxu1  ;;  %p3176_p3 = pnand %p3175_p12, %p3169_p9 }
 0x33d   : > { %1819 = vst [vmem:[#allocation20 + $0x58] sm:$0xff] %v1803_v42  ;;  %v1805_v48 = vadd.f32 %v2584_v47, %v1789_v45  ;;  %v1613_v49 = vpop.f32.mrb[45].mxu1 }
 0x33e   : > { %1818 = vst [vmem:[#allocation20 + $0x50] sm:$0xff] %v1802_v44  ;;  %v1804_v50 = vadd.f32 %v1788_v46, %v1613_v49  ;;  %v2587_v53 = vpop.f32.mrb[46].mxu1 }
 0x33f   : > { %1821 = vst [vmem:[#allocation20 + $0x68] sm:$0xff] %v1805_v48  ;;  %v1807_v54 = vadd.f32 %v2587_v53, %v1791_v51  ;;  %v1623_v55 = vpop.f32.mrb[47].mxu1 }
 0x340   : > { %1820 = vst [vmem:[#allocation20 + $0x60] sm:$0xff] %v1804_v50  ;;  %v1806_v56 = vadd.f32 %v1790_v52, %v1623_v55 }
 0x341   : > { %1823 = vst [vmem:[#allocation20 + $0x78] sm:$0xff] %v1807_v54 }
 0x342   : > { %1822 = vst [vmem:[#allocation20 + $0x70] sm:$0xff] %v1806_v56 }
 0x343   : > { %3179 = shalt.err (!%p3176_p3)
}
 0x344   : > { %s3180_s27 = scalar_lea.hbm %s3758_s10, 2048 }
 0x345   : > { %p3181_p8 = scmp.ne.s32.totalorder %s3758_s10, %s3180_s27  ;;  %p3186_p0 = scmp.lt.u32.totalorder %s3180_s27, %s3758_s10 }
 0x347   : > { %p3182_p4 = pnand %p3181_p8, %p2860_p2 }
 0x349   : > { %p3183_p13 = pneg %p3182_p4 }
 0x34b   : > { %p3188_p1 = pnand %p3186_p0, %p3183_p13 }
 0x34d   : > { %3191 = shalt.err (!%p3188_p1)
}
 0x34e   : > { %2815 = dma.vmem_to_hbm [thread:$0]  (%p2860_p2), %s1902_s24, 2048, %s3758_s10, [#allocation21], %s3239_s28, %s3239_s28, %s3240_s29  }
 0x34f   : > { %3213 = dma.done.wait (%p2860_p2), [#allocation6], 2048  }
 0x350   : > { %3215 = vsyncadd (%p2860_p2), [#allocation6], 4294965248 }
 0x351   : > { %3217 = dma.done.wait (%p2860_p2), [#allocation18], 4096  }
 0x352   : > { %3219 = vsyncadd (%p2860_p2), [#allocation18], 4294963200 }
 0x353   : > { %3221 = dma.done.wait (%p2860_p2), [#allocation21], 2048  }
 0x354   : > { %3223 = vsyncadd (%p2860_p2), [#allocation21], 4294965248 }
 0x355 PF: > { %s28_s13 = sadd.s32 1, %s3226_s13  }
 0x356   : > { %p25_p6 = scmp.ge.s32.totalorder %s28_s13, 4  }
 0x358   :  { %27 = sbr.rel (!%p25_p6) target bundleno = 7 (0x7), region = 129 }
 0x35f   :  { %1929 = vsyncpa [#allocation5], 1 }
 0x360   :  { %1931 = vsyncpa [#allocation5 + $0x1], 1 }
 0x361   :  { %1932 = vsyncpa [#allocation8], 1 }
 0x362   :  { %1933 = vsyncpa [#allocation11], 1 }
 0x363   :  { %1934 = vsyncpa [#allocation14], 1 }
 0x364   :  { %1935 = vsyncpa [#allocation6], 1 }
 0x365   :  { %1937 = vsyncpa [#allocation6 + $0x1], 1 }
 0x366   :  { %1938 = vsyncpa [#allocation18], 1 }
 0x367   :  { %1939 = vsyncpa [#allocation21], 1 }

</bundles_post_ra>
